<compile_context>
chip_gen: v5e
topology: v5e:2x2
jax: 0.10.0
libtpu: 0.0.40
codegen_flags: <defaults>
</compile_context>

<pallas_src>
import functools

import jax
import jax.numpy as jnp
from jax.experimental import pallas as pl
from jax.experimental.pallas import tpu as pltpu


def _round_up(v, m):
  return ((v + m - 1) // m) * m


def _choose_rows(B, T):
  """Rows per grid step.

  Whole sequences per tile (R = g*T, g | B) so the roll+mask tap scheme never
  crosses a sequence boundary; targets 512-1024 rows (roofline step), prefers
  256-row alignment (fills the v6e/v7x MXU tile) and >=2 grid steps (so the
  "parallel" axis can shard tiles across v7x's two TensorCores).
  """
  M = B * T
  best_r, best_score = None, None
  for g in range(1, B + 1):
    if B % g:
      continue
    R = g * T
    if R % 8:
      continue
    steps = M // R
    score = 0.0
    if 256 <= R <= 1024:
      score += 4.0
    elif R > 1024:
      score -= float(R // 1024)
    if R % 256 == 0:
      score += 2.0
    if steps >= 2:
      score += 3.0
    score += min(R, 1024) / 1024.0
    if best_score is None or score > best_score:
      best_r, best_score = R, score
  return best_r if best_r is not None else M   # full array == one tile


def _const_spec(shape):
  """BlockSpec for a grid-invariant operand; single-buffered when supported."""
  idx = lambda i, lens, _n=len(shape): (0,) * _n
  try:
    return pl.BlockSpec(shape, idx, pipeline_mode=pl.Buffered(1))
  except TypeError:                 # older BlockSpec without pipeline_mode
    return pl.BlockSpec(shape, idx)


def _res_stack_body(lens_ref, x_ref, w1_ref, b1_ref, w2_ref, b2_ref, *,
                    kernel_size, dilation_rate, n_layers, seq_len,
                    seqs_per_tile):
  """Residual dilated-conv stack on one (R, Cp) row tile.

  Returns (x_final f32 (R, Cp), length_mask f32 (R, 1)).
  """
  R, _ = x_ref.shape
  T = seq_len
  g = seqs_per_tile
  step = pl.program_id(0)

  # Per-row time index (row % T) without vector int div/mod: g static copies
  # of a sublane iota.  Length mask from scalar-prefetched lengths in SMEM
  # (one scalar read per sequence in the tile).
  t_small = jax.lax.broadcasted_iota(jnp.int32, (T, 1), 0)
  t_idx = t_small if g == 1 else jnp.concatenate([t_small] * g, axis=0)
  parts = []
  for j in range(g):
    ln = lens_ref[step * g + j]
    parts.append((t_small < ln).astype(jnp.float32))
  mask = parts[0] if g == 1 else jnp.concatenate(parts, axis=0)   # (R, 1)

  # Per-tap validity masks, hoisted: they depend only on the dilation value,
  # not the layer index (JAX won't CSE them across layers otherwise).
  tap_valid = {}
  for dil in sorted({dilation_rate ** i for i in range(n_layers)}):
    pad = (kernel_size * dil - dil) // 2
    masks = []
    for k in range(kernel_size):
      off = k * dil - pad
      masks.append(None if off == 0
                   else jnp.logical_and(t_idx + off >= 0, t_idx + off < T))
    tap_valid[dil] = masks

  x = x_ref[...].astype(jnp.float32)

  for i in range(n_layers):
    dil = dilation_rate ** i
    pad = (kernel_size * dil - dil) // 2
    h = jnp.maximum(x, 0.0)                                   # f32 ReLU
    # Fold all K taps into the matmul LHS: roll (XLU, f32) + mask (f32 VPU),
    # cast to bf16, lane-concatenate -> one MXU matmul with K*Cp contraction.
    taps = []
    for k in range(kernel_size):
      off = k * dil - pad
      if off == 0:
        hk = h
      else:
        hk = pltpu.roll(h, shift=(-off) % R, axis=0)
        hk = jnp.where(tap_valid[dil][k], hk, 0.0)
      taps.append(hk.astype(jnp.bfloat16))
    lhs = taps[0] if kernel_size == 1 else jnp.concatenate(taps, axis=-1)
    acc = jnp.dot(lhs, w1_ref[i], preferred_element_type=jnp.float32)
    acc = acc + b1_ref[i]
    h2 = jnp.maximum(acc, 0.0).astype(jnp.bfloat16)           # ReLU
    h2 = jnp.dot(h2, w2_ref[i],
                 preferred_element_type=jnp.float32) + b2_ref[i]   # 1x1 conv
    x = (x + h2) * mask                                       # residual+mask
  return x, mask


def _attr_kernel_packed(lens_ref, x_ref, w1_ref, b1_ref, w2_ref, b2_ref,
                        wp_ref, bp_ref, out_ref, *, in_channels, **res_kwargs):
  x, mask = _res_stack_body(lens_ref, x_ref, w1_ref, b1_ref, w2_ref, b2_ref,
                            **res_kwargs)
  # wp/bp were laid out so the O projection outputs land in lanes [C, C+O)
  # of a Cp-wide result; one lane-dense f32 store carries both results.
  o = jnp.dot(x.astype(jnp.bfloat16), wp_ref[...],
              preferred_element_type=jnp.float32) + bp_ref[...]
  o = o * mask
  lane = jax.lax.broadcasted_iota(jnp.int32, x.shape, 1)
  out_ref[...] = jnp.where(lane < in_channels, x, o).astype(out_ref.dtype)


def _attr_kernel_split(lens_ref, x_ref, w1_ref, b1_ref, w2_ref, b2_ref,
                       wp_ref, bp_ref, xo_ref, o_ref, **res_kwargs):
  x, mask = _res_stack_body(lens_ref, x_ref, w1_ref, b1_ref, w2_ref, b2_ref,
                            **res_kwargs)
  o = jnp.dot(x.astype(jnp.bfloat16), wp_ref[...],
              preferred_element_type=jnp.float32) + bp_ref[...]
  xo_ref[...] = x.astype(xo_ref.dtype)
  o_ref[...] = (o * mask).astype(o_ref.dtype)


def attr_predictor(x, x_lengths, params, *, kernel_size, dilation_rate,
                   n_layers):
  """x: (B, T, C_in) float32; x_lengths: (B,) int.

  Returns (x_out (B,T,C_in), o (B,T,C_out)) — same as the PyTorch forward
  after its output transposes.
  """
  w1, b1, w2, b2, wp, bp = params
  B, T, C = x.shape
  L, K = n_layers, kernel_size
  O = wp.shape[-1]

  Cp = _round_up(C, 128)
  M = B * T
  R = _choose_rows(B, T)
  assert R % T == 0 and M % R == 0, "row tile must contain whole sequences"
  g = R // T
  grid = (M // R,)

  # ---- lane-dense padding + bf16 weights (wrapper-side, plain XLA) ---------
  xp = jnp.pad(x.astype(jnp.float32),
               ((0, 0), (0, 0), (0, Cp - C))).reshape(M, Cp)
  w1p = jnp.pad(w1.astype(jnp.float32),
                ((0, 0), (0, 0), (0, Cp - C), (0, Cp - C)))      # (L,K,Cp,Cp)
  w1cat = w1p.reshape(L, K * Cp, Cp).astype(jnp.bfloat16)        # taps on LHS contraction dim
  b1p = jnp.pad(b1.astype(jnp.float32), ((0, 0), (0, 0), (0, Cp - C)))
  w2p = jnp.pad(w2.astype(jnp.float32),
                ((0, 0), (0, Cp - C), (0, Cp - C))).astype(jnp.bfloat16)
  b2p = jnp.pad(b2.astype(jnp.float32), ((0, 0), (0, 0), (0, Cp - C)))

  packed = (C + O) <= Cp
  if packed:
    wpk = jnp.zeros((Cp, Cp), jnp.float32)
    wpk = wpk.at[:C, C:C + O].set(wp.astype(jnp.float32)).astype(jnp.bfloat16)
    bpk = jnp.zeros((1, Cp), jnp.float32)
    bpk = bpk.at[:, C:C + O].set(bp.reshape(1, O).astype(jnp.float32))
    out_w = Cp
  else:
    Op = _round_up(O, 128)
    wpk = jnp.pad(wp.astype(jnp.float32),
                  ((0, Cp - C), (0, Op - O))).astype(jnp.bfloat16)
    bpk = jnp.pad(bp.reshape(1, O).astype(jnp.float32), ((0, 0), (0, Op - O)))
    out_w = Op

  lens = x_lengths.astype(jnp.int32).reshape(B)

  res_kwargs = dict(kernel_size=K, dilation_rate=dilation_rate, n_layers=L,
                    seq_len=T, seqs_per_tile=g)

  in_specs = [
      pl.BlockSpec((R, Cp), lambda i, lens: (i, 0)),   # x rows
      _const_spec((L, K * Cp, Cp)),                    # w1 (taps folded, bf16)
      _const_spec((L, 1, Cp)),                         # b1
      _const_spec((L, Cp, Cp)),                        # w2 (bf16)
      _const_spec((L, 1, Cp)),                         # b2
      _const_spec(wpk.shape),                          # wp
      _const_spec(bpk.shape),                          # bp
  ]

  # VMEM budget derived from actual usage + headroom (not the v7x physical
  # ceiling): x/out tiles double-buffered, weights single-buffered, plus the
  # bf16 LHS and a few live f32 tile-sized temporaries.
  weight_bytes = ((w1cat.size + w2p.size + wpk.size) * 2
                  + (b1p.size + b2p.size + bpk.size) * 4)
  io_bytes = 2 * R * Cp * 4 + (2 * R * Cp * 4 if packed
                               else 2 * R * (Cp + out_w) * 4)
  tmp_bytes = R * K * Cp * 2 + 4 * R * Cp * 4
  need = weight_bytes + io_bytes + tmp_bytes
  vmem_limit = int(min(max(32 << 20, need + (16 << 20)), 96 << 20))

  cparams = pltpu.CompilerParams(
      dimension_semantics=("parallel",),       # row tiles are independent
      vmem_limit_bytes=vmem_limit)

  if packed:
    kern = functools.partial(_attr_kernel_packed, in_channels=C, **res_kwargs)
    out = pl.pallas_call(
        kern,
        grid_spec=pltpu.PrefetchScalarGridSpec(
            num_scalar_prefetch=1, grid=grid, in_specs=in_specs,
            out_specs=pl.BlockSpec((R, Cp), lambda i, lens: (i, 0))),
        out_shape=jax.ShapeDtypeStruct((M, Cp), jnp.float32),
        compiler_params=cparams,
    )(lens, xp, w1cat, b1p, w2p, b2p, wpk, bpk)
    x_out = out[:, :C].reshape(B, T, C).astype(x.dtype)
    o_out = out[:, C:C + O].reshape(B, T, O).astype(x.dtype)
  else:
    kern = functools.partial(_attr_kernel_split, **res_kwargs)
    xo, o = pl.pallas_call(
        kern,
        grid_spec=pltpu.PrefetchScalarGridSpec(
            num_scalar_prefetch=1, grid=grid, in_specs=in_specs,
            out_specs=[pl.BlockSpec((R, Cp), lambda i, lens: (i, 0)),
                       pl.BlockSpec((R, out_w), lambda i, lens: (i, 0))]),
        out_shape=(jax.ShapeDtypeStruct((M, Cp), jnp.float32),
                   jax.ShapeDtypeStruct((M, out_w), jnp.float32)),
        compiler_params=cparams,
    )(lens, xp, w1cat, b1p, w2p, b2p, wpk, bpk)
    x_out = xo[:, :C].reshape(B, T, C).astype(x.dtype)
    o_out = o[:, :O].reshape(B, T, O).astype(x.dtype)
  return x_out, o_out


def attr_predictor_ref(x, x_lengths, params, *, kernel_size, dilation_rate,
                       n_layers):
  """Pure-JAX float32 reference (same math, batched)."""
  w1, b1, w2, b2, wp, bp = params
  B, T, C = x.shape
  mask = (jnp.arange(T)[None, :] < x_lengths[:, None]).astype(jnp.float32)
  mask = mask[..., None]                                            # (B, T, 1)
  x = x.astype(jnp.float32)
  for i in range(n_layers):
    dil = dilation_rate ** i
    pad = (kernel_size * dil - dil) // 2
    h = jnp.maximum(x, 0.0)
    hp = jnp.pad(h, ((0, 0), (pad, pad), (0, 0)))
    acc = jnp.zeros((B, T, C), jnp.float32) + b1[i]
    for k in range(kernel_size):
      acc = acc + jnp.einsum('btc,cd->btd', hp[:, k * dil:k * dil + T, :],
                             w1[i, k])
    h = jnp.maximum(acc, 0.0)
    h = jnp.einsum('btc,cd->btd', h, w2[i]) + b2[i]
    x = (x + h) * mask
  o = (jnp.einsum('btc,co->bto', x, wp) + bp) * mask
  return x, o


if __name__ == "__main__":
  # Small shapes consistent with the module.
  B, T = 2, 16
  IN_CH, OUT_CH = 32, 8
  KS, DIL_RATE, N_LAYERS = 5, 1, 4

  key = jax.random.PRNGKey(0)
  ks = jax.random.split(key, 8)
  x = jax.random.normal(ks[0], (B, T, IN_CH), jnp.float32)
  x_lengths = jnp.array([16, 11], jnp.int32)

  scale = 0.1
  w1 = scale * jax.random.normal(ks[1], (N_LAYERS, KS, IN_CH, IN_CH), jnp.float32)
  b1 = scale * jax.random.normal(ks[2], (N_LAYERS, 1, IN_CH), jnp.float32)
  w2 = scale * jax.random.normal(ks[3], (N_LAYERS, IN_CH, IN_CH), jnp.float32)
  b2 = scale * jax.random.normal(ks[4], (N_LAYERS, 1, IN_CH), jnp.float32)
  wp = scale * jax.random.normal(ks[5], (IN_CH, OUT_CH), jnp.float32)
  bp = scale * jax.random.normal(ks[6], (1, OUT_CH), jnp.float32)
  params = (w1, b1, w2, b2, wp, bp)

  x_out, o_out = attr_predictor(x, x_lengths, params,
                                kernel_size=KS, dilation_rate=DIL_RATE,
                                n_layers=N_LAYERS)
  jax.block_until_ready((x_out, o_out))

  x_ref_out, o_ref_out = attr_predictor_ref(x, x_lengths, params,
                                            kernel_size=KS,
                                            dilation_rate=DIL_RATE,
                                            n_layers=N_LAYERS)
  # Tolerances relaxed slightly vs the f32 reference because MXU operands are
  # cast to bf16 (accumulation stays f32).
  assert jnp.allclose(x_out, x_ref_out, atol=3e-2, rtol=3e-2), "x mismatch"
  assert jnp.allclose(o_out, o_ref_out, atol=3e-2, rtol=3e-2), "o mismatch"
  print("KERNEL_OK")
</pallas_src>

<mosaic_0001>
module attributes {stable_mosaic.version = 11 : i64} {
  func.func @_attr_kernel_packed(%arg0: i32, %arg1: memref<2xi32, #tpu.memory_space<smem>>, %arg2: memref<16x128xf32, #tpu.memory_space<vmem>>, %arg3: memref<4x640x128xbf16, #tpu.memory_space<vmem>>, %arg4: memref<4x1x128xf32, #tpu.memory_space<vmem>>, %arg5: memref<4x128x128xbf16, #tpu.memory_space<vmem>>, %arg6: memref<4x1x128xf32, #tpu.memory_space<vmem>>, %arg7: memref<128x128xbf16, #tpu.memory_space<vmem>>, %arg8: memref<1x128xf32, #tpu.memory_space<vmem>>, %arg9: memref<16x128xf32, #tpu.memory_space<vmem>>) attributes {dimension_semantics = [#tpu.dimension_semantics<parallel>], iteration_bounds = array<i64: 2>, scalar_prefetch = 1 : i64, scratch_operands = 0 : i64, tpu.core_type = #tpu.core_type<tc>, window_params = [{transform_indices = @transform_0, window_bounds = array<i64: 16, 128>}, {pipeline_mode = #tpu.pipeline_mode<synchronous>, transform_indices = @transform_1, window_bounds = array<i64: 4, 640, 128>}, {pipeline_mode = #tpu.pipeline_mode<synchronous>, transform_indices = @transform_2, window_bounds = array<i64: 4, 1, 128>}, {pipeline_mode = #tpu.pipeline_mode<synchronous>, transform_indices = @transform_3, window_bounds = array<i64: 4, 128, 128>}, {pipeline_mode = #tpu.pipeline_mode<synchronous>, transform_indices = @transform_4, window_bounds = array<i64: 4, 1, 128>}, {pipeline_mode = #tpu.pipeline_mode<synchronous>, transform_indices = @transform_5, window_bounds = array<i64: 128, 128>}, {pipeline_mode = #tpu.pipeline_mode<synchronous>, transform_indices = @transform_6, window_bounds = array<i64: 1, 128>}, {transform_indices = @transform_7, window_bounds = array<i64: 16, 128>}]} {
    %0 = tpu.iota {dimensions = array<i32: 0>} : vector<16x1xi32>
    %c1_i32 = arith.constant 1 : i32
    %1 = arith.muli %arg0, %c1_i32 : i32
    %c0_i32 = arith.constant 0 : i32
    %2 = arith.addi %1, %c0_i32 : i32
    %3 = arith.index_cast %2 : i32 to index
    %4 = memref.load %arg1[%3] : memref<2xi32, #tpu.memory_space<smem>>
    %5 = vector.broadcast %4 : i32 to vector<16x1xi32>
    %6 = arith.cmpi slt, %0, %5 : vector<16x1xi32>
    %7 = arith.extui %6 : vector<16x1xi1> to vector<16x1xi32>
    %8 = arith.sitofp %7 : vector<16x1xi32> to vector<16x1xf32>
    %c-2_i32 = arith.constant -2 : i32
    %9 = vector.broadcast %c-2_i32 : i32 to vector<16x1xi32>
    %10 = arith.addi %0, %9 : vector<16x1xi32>
    %c0_i32_0 = arith.constant 0 : i32
    %11 = vector.broadcast %c0_i32_0 : i32 to vector<16x1xi32>
    %12 = arith.cmpi sge, %10, %11 : vector<16x1xi32>
    %c-2_i32_1 = arith.constant -2 : i32
    %13 = vector.broadcast %c-2_i32_1 : i32 to vector<16x1xi32>
    %14 = arith.addi %0, %13 : vector<16x1xi32>
    %c16_i32 = arith.constant 16 : i32
    %15 = vector.broadcast %c16_i32 : i32 to vector<16x1xi32>
    %16 = arith.cmpi slt, %14, %15 : vector<16x1xi32>
    %17 = arith.andi %12, %16 : vector<16x1xi1>
    %c-1_i32 = arith.constant -1 : i32
    %18 = vector.broadcast %c-1_i32 : i32 to vector<16x1xi32>
    %19 = arith.addi %0, %18 : vector<16x1xi32>
    %c0_i32_2 = arith.constant 0 : i32
    %20 = vector.broadcast %c0_i32_2 : i32 to vector<16x1xi32>
    %21 = arith.cmpi sge, %19, %20 : vector<16x1xi32>
    %c-1_i32_3 = arith.constant -1 : i32
    %22 = vector.broadcast %c-1_i32_3 : i32 to vector<16x1xi32>
    %23 = arith.addi %0, %22 : vector<16x1xi32>
    %c16_i32_4 = arith.constant 16 : i32
    %24 = vector.broadcast %c16_i32_4 : i32 to vector<16x1xi32>
    %25 = arith.cmpi slt, %23, %24 : vector<16x1xi32>
    %26 = arith.andi %21, %25 : vector<16x1xi1>
    %c1_i32_5 = arith.constant 1 : i32
    %27 = vector.broadcast %c1_i32_5 : i32 to vector<16x1xi32>
    %28 = arith.addi %0, %27 : vector<16x1xi32>
    %c0_i32_6 = arith.constant 0 : i32
    %29 = vector.broadcast %c0_i32_6 : i32 to vector<16x1xi32>
    %30 = arith.cmpi sge, %28, %29 : vector<16x1xi32>
    %c1_i32_7 = arith.constant 1 : i32
    %31 = vector.broadcast %c1_i32_7 : i32 to vector<16x1xi32>
    %32 = arith.addi %0, %31 : vector<16x1xi32>
    %c16_i32_8 = arith.constant 16 : i32
    %33 = vector.broadcast %c16_i32_8 : i32 to vector<16x1xi32>
    %34 = arith.cmpi slt, %32, %33 : vector<16x1xi32>
    %35 = arith.andi %30, %34 : vector<16x1xi1>
    %c2_i32 = arith.constant 2 : i32
    %36 = vector.broadcast %c2_i32 : i32 to vector<16x1xi32>
    %37 = arith.addi %0, %36 : vector<16x1xi32>
    %c0_i32_9 = arith.constant 0 : i32
    %38 = vector.broadcast %c0_i32_9 : i32 to vector<16x1xi32>
    %39 = arith.cmpi sge, %37, %38 : vector<16x1xi32>
    %c2_i32_10 = arith.constant 2 : i32
    %40 = vector.broadcast %c2_i32_10 : i32 to vector<16x1xi32>
    %41 = arith.addi %0, %40 : vector<16x1xi32>
    %c16_i32_11 = arith.constant 16 : i32
    %42 = vector.broadcast %c16_i32_11 : i32 to vector<16x1xi32>
    %43 = arith.cmpi slt, %41, %42 : vector<16x1xi32>
    %44 = arith.andi %39, %43 : vector<16x1xi1>
    %c0 = arith.constant 0 : index
    %c0_12 = arith.constant 0 : index
    %45 = vector.load %arg2[%c0, %c0_12] : memref<16x128xf32, #tpu.memory_space<vmem>>, vector<16x128xf32>
    %cst = arith.constant 0.000000e+00 : f32
    %46 = vector.broadcast %cst : f32 to vector<16x128xf32>
    %47 = arith.maximumf %45, %46 : vector<16x128xf32>
    %c2_i32_13 = arith.constant 2 : i32
    %48 = tpu.dynamic_rotate %47 by %c2_i32_13 dim 0 : vector<16x128xf32>, i32 -> vector<16x128xf32>
    %cst_14 = arith.constant 0.000000e+00 : f32
    %49 = vector.shape_cast %17 : vector<16x1xi1> to vector<16x1xi1>
    %50 = vector.broadcast %49 : vector<16x1xi1> to vector<16x128xi1>
    %51 = vector.broadcast %cst_14 : f32 to vector<16x128xf32>
    %52 = arith.select %50, %48, %51 : vector<16x128xi1>, vector<16x128xf32>
    %53 = arith.truncf %52 : vector<16x128xf32> to vector<16x128xbf16>
    %c1_i32_15 = arith.constant 1 : i32
    %54 = tpu.dynamic_rotate %47 by %c1_i32_15 dim 0 : vector<16x128xf32>, i32 -> vector<16x128xf32>
    %cst_16 = arith.constant 0.000000e+00 : f32
    %55 = vector.shape_cast %26 : vector<16x1xi1> to vector<16x1xi1>
    %56 = vector.broadcast %55 : vector<16x1xi1> to vector<16x128xi1>
    %57 = vector.broadcast %cst_16 : f32 to vector<16x128xf32>
    %58 = arith.select %56, %54, %57 : vector<16x128xi1>, vector<16x128xf32>
    %59 = arith.truncf %58 : vector<16x128xf32> to vector<16x128xbf16>
    %60 = arith.truncf %47 : vector<16x128xf32> to vector<16x128xbf16>
    %c15_i32 = arith.constant 15 : i32
    %61 = tpu.dynamic_rotate %47 by %c15_i32 dim 0 : vector<16x128xf32>, i32 -> vector<16x128xf32>
    %cst_17 = arith.constant 0.000000e+00 : f32
    %62 = vector.shape_cast %35 : vector<16x1xi1> to vector<16x1xi1>
    %63 = vector.broadcast %62 : vector<16x1xi1> to vector<16x128xi1>
    %64 = vector.broadcast %cst_17 : f32 to vector<16x128xf32>
    %65 = arith.select %63, %61, %64 : vector<16x128xi1>, vector<16x128xf32>
    %66 = arith.truncf %65 : vector<16x128xf32> to vector<16x128xbf16>
    %c14_i32 = arith.constant 14 : i32
    %67 = tpu.dynamic_rotate %47 by %c14_i32 dim 0 : vector<16x128xf32>, i32 -> vector<16x128xf32>
    %cst_18 = arith.constant 0.000000e+00 : f32
    %68 = vector.shape_cast %44 : vector<16x1xi1> to vector<16x1xi1>
    %69 = vector.broadcast %68 : vector<16x1xi1> to vector<16x128xi1>
    %70 = vector.broadcast %cst_18 : f32 to vector<16x128xf32>
    %71 = arith.select %69, %67, %70 : vector<16x128xi1>, vector<16x128xf32>
    %72 = arith.truncf %71 : vector<16x128xf32> to vector<16x128xbf16>
    %73 = tpu.concatenate %53, %59, %60, %66, %72 in 1 : vector<16x128xbf16>, vector<16x128xbf16>, vector<16x128xbf16>, vector<16x128xbf16>, vector<16x128xbf16> -> vector<16x640xbf16>
    %c0_19 = arith.constant 0 : index
    %c0_20 = arith.constant 0 : index
    %c0_21 = arith.constant 0 : index
    %74 = vector.load %arg3[%c0_19, %c0_20, %c0_21] : memref<4x640x128xbf16, #tpu.memory_space<vmem>>, vector<1x640x128xbf16>
    %75 = vector.shape_cast %74 : vector<1x640x128xbf16> to vector<640x128xbf16>
    %cst_22 = arith.constant dense<0.000000e+00> : vector<16x128xf32>
    %76 = tpu.matmul %73, %75, %cst_22 {dimension_numbers = #tpu.dot_dimension_numbers<[1], [0], [0], [1], [0, 0, 1, 1], [], []>} : vector<16x640xbf16>, vector<640x128xbf16>, vector<16x128xf32> -> vector<16x128xf32>
    %c0_23 = arith.constant 0 : index
    %c0_24 = arith.constant 0 : index
    %c0_25 = arith.constant 0 : index
    %77 = vector.load %arg4[%c0_23, %c0_24, %c0_25] : memref<4x1x128xf32, #tpu.memory_space<vmem>>, vector<1x1x128xf32>
    %78 = vector.shape_cast %77 : vector<1x1x128xf32> to vector<1x128xf32>
    %79 = vector.broadcast %78 : vector<1x128xf32> to vector<16x128xf32>
    %80 = arith.addf %76, %79 : vector<16x128xf32>
    %cst_26 = arith.constant 0.000000e+00 : f32
    %81 = vector.broadcast %cst_26 : f32 to vector<16x128xf32>
    %82 = arith.maximumf %80, %81 : vector<16x128xf32>
    %83 = arith.truncf %82 : vector<16x128xf32> to vector<16x128xbf16>
    %c0_27 = arith.constant 0 : index
    %c0_28 = arith.constant 0 : index
    %c0_29 = arith.constant 0 : index
    %84 = vector.load %arg5[%c0_27, %c0_28, %c0_29] : memref<4x128x128xbf16, #tpu.memory_space<vmem>>, vector<1x128x128xbf16>
    %85 = vector.shape_cast %84 : vector<1x128x128xbf16> to vector<128x128xbf16>
    %cst_30 = arith.constant dense<0.000000e+00> : vector<16x128xf32>
    %86 = tpu.matmul %83, %85, %cst_30 {dimension_numbers = #tpu.dot_dimension_numbers<[1], [0], [0], [1], [0, 0, 1, 1], [], []>} : vector<16x128xbf16>, vector<128x128xbf16>, vector<16x128xf32> -> vector<16x128xf32>
    %c0_31 = arith.constant 0 : index
    %c0_32 = arith.constant 0 : index
    %c0_33 = arith.constant 0 : index
    %87 = vector.load %arg6[%c0_31, %c0_32, %c0_33] : memref<4x1x128xf32, #tpu.memory_space<vmem>>, vector<1x1x128xf32>
    %88 = vector.shape_cast %87 : vector<1x1x128xf32> to vector<1x128xf32>
    %89 = vector.broadcast %88 : vector<1x128xf32> to vector<16x128xf32>
    %90 = arith.addf %86, %89 : vector<16x128xf32>
    %91 = arith.addf %45, %90 : vector<16x128xf32>
    %92 = vector.broadcast %8 : vector<16x1xf32> to vector<16x128xf32>
    %93 = arith.mulf %91, %92 : vector<16x128xf32>
    %cst_34 = arith.constant 0.000000e+00 : f32
    %94 = vector.broadcast %cst_34 : f32 to vector<16x128xf32>
    %95 = arith.maximumf %93, %94 : vector<16x128xf32>
    %c2_i32_35 = arith.constant 2 : i32
    %96 = tpu.dynamic_rotate %95 by %c2_i32_35 dim 0 : vector<16x128xf32>, i32 -> vector<16x128xf32>
    %cst_36 = arith.constant 0.000000e+00 : f32
    %97 = vector.shape_cast %17 : vector<16x1xi1> to vector<16x1xi1>
    %98 = vector.broadcast %97 : vector<16x1xi1> to vector<16x128xi1>
    %99 = vector.broadcast %cst_36 : f32 to vector<16x128xf32>
    %100 = arith.select %98, %96, %99 : vector<16x128xi1>, vector<16x128xf32>
    %101 = arith.truncf %100 : vector<16x128xf32> to vector<16x128xbf16>
    %c1_i32_37 = arith.constant 1 : i32
    %102 = tpu.dynamic_rotate %95 by %c1_i32_37 dim 0 : vector<16x128xf32>, i32 -> vector<16x128xf32>
    %cst_38 = arith.constant 0.000000e+00 : f32
    %103 = vector.shape_cast %26 : vector<16x1xi1> to vector<16x1xi1>
    %104 = vector.broadcast %103 : vector<16x1xi1> to vector<16x128xi1>
    %105 = vector.broadcast %cst_38 : f32 to vector<16x128xf32>
    %106 = arith.select %104, %102, %105 : vector<16x128xi1>, vector<16x128xf32>
    %107 = arith.truncf %106 : vector<16x128xf32> to vector<16x128xbf16>
    %108 = arith.truncf %95 : vector<16x128xf32> to vector<16x128xbf16>
    %c15_i32_39 = arith.constant 15 : i32
    %109 = tpu.dynamic_rotate %95 by %c15_i32_39 dim 0 : vector<16x128xf32>, i32 -> vector<16x128xf32>
    %cst_40 = arith.constant 0.000000e+00 : f32
    %110 = vector.shape_cast %35 : vector<16x1xi1> to vector<16x1xi1>
    %111 = vector.broadcast %110 : vector<16x1xi1> to vector<16x128xi1>
    %112 = vector.broadcast %cst_40 : f32 to vector<16x128xf32>
    %113 = arith.select %111, %109, %112 : vector<16x128xi1>, vector<16x128xf32>
    %114 = arith.truncf %113 : vector<16x128xf32> to vector<16x128xbf16>
    %c14_i32_41 = arith.constant 14 : i32
    %115 = tpu.dynamic_rotate %95 by %c14_i32_41 dim 0 : vector<16x128xf32>, i32 -> vector<16x128xf32>
    %cst_42 = arith.constant 0.000000e+00 : f32
    %116 = vector.shape_cast %44 : vector<16x1xi1> to vector<16x1xi1>
    %117 = vector.broadcast %116 : vector<16x1xi1> to vector<16x128xi1>
    %118 = vector.broadcast %cst_42 : f32 to vector<16x128xf32>
    %119 = arith.select %117, %115, %118 : vector<16x128xi1>, vector<16x128xf32>
    %120 = arith.truncf %119 : vector<16x128xf32> to vector<16x128xbf16>
    %121 = tpu.concatenate %101, %107, %108, %114, %120 in 1 : vector<16x128xbf16>, vector<16x128xbf16>, vector<16x128xbf16>, vector<16x128xbf16>, vector<16x128xbf16> -> vector<16x640xbf16>
    %c1 = arith.constant 1 : index
    %c0_43 = arith.constant 0 : index
    %c0_44 = arith.constant 0 : index
    %122 = vector.load %arg3[%c1, %c0_43, %c0_44] : memref<4x640x128xbf16, #tpu.memory_space<vmem>>, vector<1x640x128xbf16>
    %123 = vector.shape_cast %122 : vector<1x640x128xbf16> to vector<640x128xbf16>
    %cst_45 = arith.constant dense<0.000000e+00> : vector<16x128xf32>
    %124 = tpu.matmul %121, %123, %cst_45 {dimension_numbers = #tpu.dot_dimension_numbers<[1], [0], [0], [1], [0, 0, 1, 1], [], []>} : vector<16x640xbf16>, vector<640x128xbf16>, vector<16x128xf32> -> vector<16x128xf32>
    %c1_46 = arith.constant 1 : index
    %c0_47 = arith.constant 0 : index
    %c0_48 = arith.constant 0 : index
    %125 = vector.load %arg4[%c1_46, %c0_47, %c0_48] : memref<4x1x128xf32, #tpu.memory_space<vmem>>, vector<1x1x128xf32>
    %126 = vector.shape_cast %125 : vector<1x1x128xf32> to vector<1x128xf32>
    %127 = vector.broadcast %126 : vector<1x128xf32> to vector<16x128xf32>
    %128 = arith.addf %124, %127 : vector<16x128xf32>
    %cst_49 = arith.constant 0.000000e+00 : f32
    %129 = vector.broadcast %cst_49 : f32 to vector<16x128xf32>
    %130 = arith.maximumf %128, %129 : vector<16x128xf32>
    %131 = arith.truncf %130 : vector<16x128xf32> to vector<16x128xbf16>
    %c1_50 = arith.constant 1 : index
    %c0_51 = arith.constant 0 : index
    %c0_52 = arith.constant 0 : index
    %132 = vector.load %arg5[%c1_50, %c0_51, %c0_52] : memref<4x128x128xbf16, #tpu.memory_space<vmem>>, vector<1x128x128xbf16>
    %133 = vector.shape_cast %132 : vector<1x128x128xbf16> to vector<128x128xbf16>
    %cst_53 = arith.constant dense<0.000000e+00> : vector<16x128xf32>
    %134 = tpu.matmul %131, %133, %cst_53 {dimension_numbers = #tpu.dot_dimension_numbers<[1], [0], [0], [1], [0, 0, 1, 1], [], []>} : vector<16x128xbf16>, vector<128x128xbf16>, vector<16x128xf32> -> vector<16x128xf32>
    %c1_54 = arith.constant 1 : index
    %c0_55 = arith.constant 0 : index
    %c0_56 = arith.constant 0 : index
    %135 = vector.load %arg6[%c1_54, %c0_55, %c0_56] : memref<4x1x128xf32, #tpu.memory_space<vmem>>, vector<1x1x128xf32>
    %136 = vector.shape_cast %135 : vector<1x1x128xf32> to vector<1x128xf32>
    %137 = vector.broadcast %136 : vector<1x128xf32> to vector<16x128xf32>
    %138 = arith.addf %134, %137 : vector<16x128xf32>
    %139 = arith.addf %93, %138 : vector<16x128xf32>
    %140 = vector.broadcast %8 : vector<16x1xf32> to vector<16x128xf32>
    %141 = arith.mulf %139, %140 : vector<16x128xf32>
    %cst_57 = arith.constant 0.000000e+00 : f32
    %142 = vector.broadcast %cst_57 : f32 to vector<16x128xf32>
    %143 = arith.maximumf %141, %142 : vector<16x128xf32>
    %c2_i32_58 = arith.constant 2 : i32
    %144 = tpu.dynamic_rotate %143 by %c2_i32_58 dim 0 : vector<16x128xf32>, i32 -> vector<16x128xf32>
    %cst_59 = arith.constant 0.000000e+00 : f32
    %145 = vector.shape_cast %17 : vector<16x1xi1> to vector<16x1xi1>
    %146 = vector.broadcast %145 : vector<16x1xi1> to vector<16x128xi1>
    %147 = vector.broadcast %cst_59 : f32 to vector<16x128xf32>
    %148 = arith.select %146, %144, %147 : vector<16x128xi1>, vector<16x128xf32>
    %149 = arith.truncf %148 : vector<16x128xf32> to vector<16x128xbf16>
    %c1_i32_60 = arith.constant 1 : i32
    %150 = tpu.dynamic_rotate %143 by %c1_i32_60 dim 0 : vector<16x128xf32>, i32 -> vector<16x128xf32>
    %cst_61 = arith.constant 0.000000e+00 : f32
    %151 = vector.shape_cast %26 : vector<16x1xi1> to vector<16x1xi1>
    %152 = vector.broadcast %151 : vector<16x1xi1> to vector<16x128xi1>
    %153 = vector.broadcast %cst_61 : f32 to vector<16x128xf32>
    %154 = arith.select %152, %150, %153 : vector<16x128xi1>, vector<16x128xf32>
    %155 = arith.truncf %154 : vector<16x128xf32> to vector<16x128xbf16>
    %156 = arith.truncf %143 : vector<16x128xf32> to vector<16x128xbf16>
    %c15_i32_62 = arith.constant 15 : i32
    %157 = tpu.dynamic_rotate %143 by %c15_i32_62 dim 0 : vector<16x128xf32>, i32 -> vector<16x128xf32>
    %cst_63 = arith.constant 0.000000e+00 : f32
    %158 = vector.shape_cast %35 : vector<16x1xi1> to vector<16x1xi1>
    %159 = vector.broadcast %158 : vector<16x1xi1> to vector<16x128xi1>
    %160 = vector.broadcast %cst_63 : f32 to vector<16x128xf32>
    %161 = arith.select %159, %157, %160 : vector<16x128xi1>, vector<16x128xf32>
    %162 = arith.truncf %161 : vector<16x128xf32> to vector<16x128xbf16>
    %c14_i32_64 = arith.constant 14 : i32
    %163 = tpu.dynamic_rotate %143 by %c14_i32_64 dim 0 : vector<16x128xf32>, i32 -> vector<16x128xf32>
    %cst_65 = arith.constant 0.000000e+00 : f32
    %164 = vector.shape_cast %44 : vector<16x1xi1> to vector<16x1xi1>
    %165 = vector.broadcast %164 : vector<16x1xi1> to vector<16x128xi1>
    %166 = vector.broadcast %cst_65 : f32 to vector<16x128xf32>
    %167 = arith.select %165, %163, %166 : vector<16x128xi1>, vector<16x128xf32>
    %168 = arith.truncf %167 : vector<16x128xf32> to vector<16x128xbf16>
    %169 = tpu.concatenate %149, %155, %156, %162, %168 in 1 : vector<16x128xbf16>, vector<16x128xbf16>, vector<16x128xbf16>, vector<16x128xbf16>, vector<16x128xbf16> -> vector<16x640xbf16>
    %c2 = arith.constant 2 : index
    %c0_66 = arith.constant 0 : index
    %c0_67 = arith.constant 0 : index
    %170 = vector.load %arg3[%c2, %c0_66, %c0_67] : memref<4x640x128xbf16, #tpu.memory_space<vmem>>, vector<1x640x128xbf16>
    %171 = vector.shape_cast %170 : vector<1x640x128xbf16> to vector<640x128xbf16>
    %cst_68 = arith.constant dense<0.000000e+00> : vector<16x128xf32>
    %172 = tpu.matmul %169, %171, %cst_68 {dimension_numbers = #tpu.dot_dimension_numbers<[1], [0], [0], [1], [0, 0, 1, 1], [], []>} : vector<16x640xbf16>, vector<640x128xbf16>, vector<16x128xf32> -> vector<16x128xf32>
    %c2_69 = arith.constant 2 : index
    %c0_70 = arith.constant 0 : index
    %c0_71 = arith.constant 0 : index
    %173 = vector.load %arg4[%c2_69, %c0_70, %c0_71] : memref<4x1x128xf32, #tpu.memory_space<vmem>>, vector<1x1x128xf32>
    %174 = vector.shape_cast %173 : vector<1x1x128xf32> to vector<1x128xf32>
    %175 = vector.broadcast %174 : vector<1x128xf32> to vector<16x128xf32>
    %176 = arith.addf %172, %175 : vector<16x128xf32>
    %cst_72 = arith.constant 0.000000e+00 : f32
    %177 = vector.broadcast %cst_72 : f32 to vector<16x128xf32>
    %178 = arith.maximumf %176, %177 : vector<16x128xf32>
    %179 = arith.truncf %178 : vector<16x128xf32> to vector<16x128xbf16>
    %c2_73 = arith.constant 2 : index
    %c0_74 = arith.constant 0 : index
    %c0_75 = arith.constant 0 : index
    %180 = vector.load %arg5[%c2_73, %c0_74, %c0_75] : memref<4x128x128xbf16, #tpu.memory_space<vmem>>, vector<1x128x128xbf16>
    %181 = vector.shape_cast %180 : vector<1x128x128xbf16> to vector<128x128xbf16>
    %cst_76 = arith.constant dense<0.000000e+00> : vector<16x128xf32>
    %182 = tpu.matmul %179, %181, %cst_76 {dimension_numbers = #tpu.dot_dimension_numbers<[1], [0], [0], [1], [0, 0, 1, 1], [], []>} : vector<16x128xbf16>, vector<128x128xbf16>, vector<16x128xf32> -> vector<16x128xf32>
    %c2_77 = arith.constant 2 : index
    %c0_78 = arith.constant 0 : index
    %c0_79 = arith.constant 0 : index
    %183 = vector.load %arg6[%c2_77, %c0_78, %c0_79] : memref<4x1x128xf32, #tpu.memory_space<vmem>>, vector<1x1x128xf32>
    %184 = vector.shape_cast %183 : vector<1x1x128xf32> to vector<1x128xf32>
    %185 = vector.broadcast %184 : vector<1x128xf32> to vector<16x128xf32>
    %186 = arith.addf %182, %185 : vector<16x128xf32>
    %187 = arith.addf %141, %186 : vector<16x128xf32>
    %188 = vector.broadcast %8 : vector<16x1xf32> to vector<16x128xf32>
    %189 = arith.mulf %187, %188 : vector<16x128xf32>
    %cst_80 = arith.constant 0.000000e+00 : f32
    %190 = vector.broadcast %cst_80 : f32 to vector<16x128xf32>
    %191 = arith.maximumf %189, %190 : vector<16x128xf32>
    %c2_i32_81 = arith.constant 2 : i32
    %192 = tpu.dynamic_rotate %191 by %c2_i32_81 dim 0 : vector<16x128xf32>, i32 -> vector<16x128xf32>
    %cst_82 = arith.constant 0.000000e+00 : f32
    %193 = vector.shape_cast %17 : vector<16x1xi1> to vector<16x1xi1>
    %194 = vector.broadcast %193 : vector<16x1xi1> to vector<16x128xi1>
    %195 = vector.broadcast %cst_82 : f32 to vector<16x128xf32>
    %196 = arith.select %194, %192, %195 : vector<16x128xi1>, vector<16x128xf32>
    %197 = arith.truncf %196 : vector<16x128xf32> to vector<16x128xbf16>
    %c1_i32_83 = arith.constant 1 : i32
    %198 = tpu.dynamic_rotate %191 by %c1_i32_83 dim 0 : vector<16x128xf32>, i32 -> vector<16x128xf32>
    %cst_84 = arith.constant 0.000000e+00 : f32
    %199 = vector.shape_cast %26 : vector<16x1xi1> to vector<16x1xi1>
    %200 = vector.broadcast %199 : vector<16x1xi1> to vector<16x128xi1>
    %201 = vector.broadcast %cst_84 : f32 to vector<16x128xf32>
    %202 = arith.select %200, %198, %201 : vector<16x128xi1>, vector<16x128xf32>
    %203 = arith.truncf %202 : vector<16x128xf32> to vector<16x128xbf16>
    %204 = arith.truncf %191 : vector<16x128xf32> to vector<16x128xbf16>
    %c15_i32_85 = arith.constant 15 : i32
    %205 = tpu.dynamic_rotate %191 by %c15_i32_85 dim 0 : vector<16x128xf32>, i32 -> vector<16x128xf32>
    %cst_86 = arith.constant 0.000000e+00 : f32
    %206 = vector.shape_cast %35 : vector<16x1xi1> to vector<16x1xi1>
    %207 = vector.broadcast %206 : vector<16x1xi1> to vector<16x128xi1>
    %208 = vector.broadcast %cst_86 : f32 to vector<16x128xf32>
    %209 = arith.select %207, %205, %208 : vector<16x128xi1>, vector<16x128xf32>
    %210 = arith.truncf %209 : vector<16x128xf32> to vector<16x128xbf16>
    %c14_i32_87 = arith.constant 14 : i32
    %211 = tpu.dynamic_rotate %191 by %c14_i32_87 dim 0 : vector<16x128xf32>, i32 -> vector<16x128xf32>
    %cst_88 = arith.constant 0.000000e+00 : f32
    %212 = vector.shape_cast %44 : vector<16x1xi1> to vector<16x1xi1>
    %213 = vector.broadcast %212 : vector<16x1xi1> to vector<16x128xi1>
    %214 = vector.broadcast %cst_88 : f32 to vector<16x128xf32>
    %215 = arith.select %213, %211, %214 : vector<16x128xi1>, vector<16x128xf32>
    %216 = arith.truncf %215 : vector<16x128xf32> to vector<16x128xbf16>
    %217 = tpu.concatenate %197, %203, %204, %210, %216 in 1 : vector<16x128xbf16>, vector<16x128xbf16>, vector<16x128xbf16>, vector<16x128xbf16>, vector<16x128xbf16> -> vector<16x640xbf16>
    %c3 = arith.constant 3 : index
    %c0_89 = arith.constant 0 : index
    %c0_90 = arith.constant 0 : index
    %218 = vector.load %arg3[%c3, %c0_89, %c0_90] : memref<4x640x128xbf16, #tpu.memory_space<vmem>>, vector<1x640x128xbf16>
    %219 = vector.shape_cast %218 : vector<1x640x128xbf16> to vector<640x128xbf16>
    %cst_91 = arith.constant dense<0.000000e+00> : vector<16x128xf32>
    %220 = tpu.matmul %217, %219, %cst_91 {dimension_numbers = #tpu.dot_dimension_numbers<[1], [0], [0], [1], [0, 0, 1, 1], [], []>} : vector<16x640xbf16>, vector<640x128xbf16>, vector<16x128xf32> -> vector<16x128xf32>
    %c3_92 = arith.constant 3 : index
    %c0_93 = arith.constant 0 : index
    %c0_94 = arith.constant 0 : index
    %221 = vector.load %arg4[%c3_92, %c0_93, %c0_94] : memref<4x1x128xf32, #tpu.memory_space<vmem>>, vector<1x1x128xf32>
    %222 = vector.shape_cast %221 : vector<1x1x128xf32> to vector<1x128xf32>
    %223 = vector.broadcast %222 : vector<1x128xf32> to vector<16x128xf32>
    %224 = arith.addf %220, %223 : vector<16x128xf32>
    %cst_95 = arith.constant 0.000000e+00 : f32
    %225 = vector.broadcast %cst_95 : f32 to vector<16x128xf32>
    %226 = arith.maximumf %224, %225 : vector<16x128xf32>
    %227 = arith.truncf %226 : vector<16x128xf32> to vector<16x128xbf16>
    %c3_96 = arith.constant 3 : index
    %c0_97 = arith.constant 0 : index
    %c0_98 = arith.constant 0 : index
    %228 = vector.load %arg5[%c3_96, %c0_97, %c0_98] : memref<4x128x128xbf16, #tpu.memory_space<vmem>>, vector<1x128x128xbf16>
    %229 = vector.shape_cast %228 : vector<1x128x128xbf16> to vector<128x128xbf16>
    %cst_99 = arith.constant dense<0.000000e+00> : vector<16x128xf32>
    %230 = tpu.matmul %227, %229, %cst_99 {dimension_numbers = #tpu.dot_dimension_numbers<[1], [0], [0], [1], [0, 0, 1, 1], [], []>} : vector<16x128xbf16>, vector<128x128xbf16>, vector<16x128xf32> -> vector<16x128xf32>
    %c3_100 = arith.constant 3 : index
    %c0_101 = arith.constant 0 : index
    %c0_102 = arith.constant 0 : index
    %231 = vector.load %arg6[%c3_100, %c0_101, %c0_102] : memref<4x1x128xf32, #tpu.memory_space<vmem>>, vector<1x1x128xf32>
    %232 = vector.shape_cast %231 : vector<1x1x128xf32> to vector<1x128xf32>
    %233 = vector.broadcast %232 : vector<1x128xf32> to vector<16x128xf32>
    %234 = arith.addf %230, %233 : vector<16x128xf32>
    %235 = arith.addf %189, %234 : vector<16x128xf32>
    %236 = vector.broadcast %8 : vector<16x1xf32> to vector<16x128xf32>
    %237 = arith.mulf %235, %236 : vector<16x128xf32>
    %238 = arith.truncf %237 : vector<16x128xf32> to vector<16x128xbf16>
    %c0_103 = arith.constant 0 : index
    %c0_104 = arith.constant 0 : index
    %239 = vector.load %arg7[%c0_103, %c0_104] : memref<128x128xbf16, #tpu.memory_space<vmem>>, vector<128x128xbf16>
    %cst_105 = arith.constant dense<0.000000e+00> : vector<16x128xf32>
    %240 = tpu.matmul %238, %239, %cst_105 {dimension_numbers = #tpu.dot_dimension_numbers<[1], [0], [0], [1], [0, 0, 1, 1], [], []>} : vector<16x128xbf16>, vector<128x128xbf16>, vector<16x128xf32> -> vector<16x128xf32>
    %c0_106 = arith.constant 0 : index
    %c0_107 = arith.constant 0 : index
    %241 = vector.load %arg8[%c0_106, %c0_107] : memref<1x128xf32, #tpu.memory_space<vmem>>, vector<1x128xf32>
    %242 = vector.broadcast %241 : vector<1x128xf32> to vector<16x128xf32>
    %243 = arith.addf %240, %242 : vector<16x128xf32>
    %244 = vector.broadcast %8 : vector<16x1xf32> to vector<16x128xf32>
    %245 = arith.mulf %243, %244 : vector<16x128xf32>
    %246 = tpu.iota {dimensions = array<i32: 1>} : vector<16x128xi32>
    %c32_i32 = arith.constant 32 : i32
    %247 = vector.broadcast %c32_i32 : i32 to vector<16x128xi32>
    %248 = arith.cmpi slt, %246, %247 : vector<16x128xi32>
    %249 = arith.select %248, %237, %245 : vector<16x128xi1>, vector<16x128xf32>
    %c0_108 = arith.constant 0 : index
    %c0_109 = arith.constant 0 : index
    %250 = vector.load %arg9[%c0_108, %c0_109] : memref<16x128xf32, #tpu.memory_space<vmem>>, vector<16x128xf32>
    tpu.vector_store %arg9[%c0_108, %c0_109], %249 {strides = array<i32>} : memref<16x128xf32, #tpu.memory_space<vmem>>, vector<16x128xf32>,
    return
  }
  func.func @transform_0(%arg0: i32, %arg1: memref<2xi32, #tpu.memory_space<smem>>) -> (i32, i32) {
    %c0_i32 = arith.constant 0 : i32
    %c0_i32_0 = arith.constant 0 : i32
    return %arg0, %c0_i32 : i32, i32
  }
  func.func @transform_1(%arg0: i32, %arg1: memref<2xi32, #tpu.memory_space<smem>>) -> (i32, i32, i32) {
    %c0_i32 = arith.constant 0 : i32
    %c0_i32_0 = arith.constant 0 : i32
    %c0_i32_1 = arith.constant 0 : i32
    %c0_i32_2 = arith.constant 0 : i32
    return %c0_i32, %c0_i32_0, %c0_i32_1 : i32, i32, i32
  }
  func.func @transform_2(%arg0: i32, %arg1: memref<2xi32, #tpu.memory_space<smem>>) -> (i32, i32, i32) {
    %c0_i32 = arith.constant 0 : i32
    %c0_i32_0 = arith.constant 0 : i32
    %c0_i32_1 = arith.constant 0 : i32
    %c0_i32_2 = arith.constant 0 : i32
    return %c0_i32, %c0_i32_0, %c0_i32_1 : i32, i32, i32
  }
  func.func @transform_3(%arg0: i32, %arg1: memref<2xi32, #tpu.memory_space<smem>>) -> (i32, i32, i32) {
    %c0_i32 = arith.constant 0 : i32
    %c0_i32_0 = arith.constant 0 : i32
    %c0_i32_1 = arith.constant 0 : i32
    %c0_i32_2 = arith.constant 0 : i32
    return %c0_i32, %c0_i32_0, %c0_i32_1 : i32, i32, i32
  }
  func.func @transform_4(%arg0: i32, %arg1: memref<2xi32, #tpu.memory_space<smem>>) -> (i32, i32, i32) {
    %c0_i32 = arith.constant 0 : i32
    %c0_i32_0 = arith.constant 0 : i32
    %c0_i32_1 = arith.constant 0 : i32
    %c0_i32_2 = arith.constant 0 : i32
    return %c0_i32, %c0_i32_0, %c0_i32_1 : i32, i32, i32
  }
  func.func @transform_5(%arg0: i32, %arg1: memref<2xi32, #tpu.memory_space<smem>>) -> (i32, i32) {
    %c0_i32 = arith.constant 0 : i32
    %c0_i32_0 = arith.constant 0 : i32
    %c0_i32_1 = arith.constant 0 : i32
    return %c0_i32, %c0_i32_0 : i32, i32
  }
  func.func @transform_6(%arg0: i32, %arg1: memref<2xi32, #tpu.memory_space<smem>>) -> (i32, i32) {
    %c0_i32 = arith.constant 0 : i32
    %c0_i32_0 = arith.constant 0 : i32
    %c0_i32_1 = arith.constant 0 : i32
    return %c0_i32, %c0_i32_0 : i32, i32
  }
  func.func @transform_7(%arg0: i32, %arg1: memref<2xi32, #tpu.memory_space<smem>>) -> (i32, i32) {
    %c0_i32 = arith.constant 0 : i32
    %c0_i32_0 = arith.constant 0 : i32
    return %arg0, %c0_i32 : i32, i32
  }
}

</mosaic_0001>

<bundles_post_ra>
// kernel: tpu_custom_call.1
= control target key start
LH: loop header
LB: loop body
LE: loop exit
PB: predicated region body
PF: predicated region fallthrough
CT: control target
= control target key end

     0   :  { %s4243_s30 = smov [#allocation3]   ;;  %s4679_s0 = inlined_call_operand.hbm [shape: s32[2], index: 0, kind: input, shape index: {}]   ;;  %s4680_s1 = inlined_call_operand.hbm [shape: f32[32,128], index: 1, kind: input, shape index: {}]   ;;  %s4681_s2 = inlined_call_operand.hbm [shape: bf16[4,640,128], index: 2, kind: input, shape index: {}]   ;;  %s4682_s3 = inlined_call_operand.hbm [shape: f32[4,1,128], index: 3, kind: input, shape index: {}]   ;;  %s4683_s4 = inlined_call_operand.hbm [shape: bf16[4,128,128], index: 4, kind: input, shape index: {}]   ;;  %s4684_s5 = inlined_call_operand.vmem [shape: f32[4,1,128], index: 5, kind: input, shape index: {}]   ;;  %s4685_s6 = inlined_call_operand.hbm [shape: bf16[128,128], index: 6, kind: input, shape index: {}]   ;;  %s4686_s7 = inlined_call_operand.vmem [shape: f32[1,128], index: 7, kind: input, shape index: {}]   ;;  %s4687_s8 = inlined_call_operand.hbm [shape: f32[32,128], index: 8, kind: output, shape index: {}]  }
   0x1   :  { %4688 = sst [smem:[#allocation19_spill]] %s4681_s2  ;;  %s14_s29 = sshll.u32 %s4679_s0, 4  ;;  %s15_s29 = int_to_ptr.hbm [resolvable:$true] %s14_s29 }
   0x2   :  { %17 = dma.hbm_to_smem %s15_s29, 16, %s4243_s30, [#allocation2] }
   0x3   :  { %4209 = dma.done.wait [#allocation2], 16 }
   0x4   :  { %4210 = vsyncadd [#allocation2], 4294967280 }
   0x5   :  { %20 = sfence }
   0x6   :  { %21 = vsyncpa [#allocation5], 0 }
   0x7   :  { %23 = vsyncpa [#allocation5 + $0x1], 0 }
   0x8   :  { %24 = vsyncpa [#allocation8], 0 }
   0x9   :  { %25 = vsyncpa [#allocation11], 0 }
   0xa   :  { %26 = vsyncpa [#allocation6], 0 }
   0xb   :  { %28 = vsyncpa [#allocation6 + $0x1], 0  ;;  %s4305_s9 = smov 0   ;;  %s4307_s10 = smov 0  }
   0xc   :  { %s4309_s11 = smov 0   ;;  %s4311_s12 = smov 0  }
   0xd LB: > { %s4326_s0 = sadd.s32 4294967295, %s4241_s12   ;;  %s2868_s13 = sadd.s32 4294967294, %s4241_s12   ;;  %s4241_s12 = sphi %s4311_s12, %s4700_s12   ;;  %s4237_s11 = sphi %s4309_s11, %s4699_s11   ;;  %s4233_s10 = sphi %s4307_s10, %s4698_s10   ;;  %s4229_s9 = sphi %s4305_s9, %s4697_s9  }
   0xe   : > { %p54_p0 = scmp.ne.s32.totalorder %s4233_s10, %s4229_s9  ;;  %p55_p1 = scmp.eq.s32.totalorder %s4326_s0, 0 }
   0xf   : > { %p204_p2 = scmp.eq.s32.totalorder %s4326_s0, 1  ;;  %p210_p3 = scmp.eq.s32.totalorder %s2868_s13, 1 }
  0x10   : > { %p4335_p4 = por %p55_p1, %p54_p0  ;;  %p2869_p5 = scmp.ge.s32.totalorder %s4241_s12, 1 }
  0x11   : > { %p4340_p6 = por %p210_p3, %p54_p0  ;;  %p217_p7 = scmp.lt.s32.totalorder %s4241_s12, 3 }
  0x12   : > { %s4691_s2 = sld [smem:[#allocation19_spill]]  ;;  %s4244_s20 = smov [#allocation7]  }
  0x13   : > { %p4348_p8 = pnand %p2869_p5, %p217_p7  ;;  %s230_s21 = sshll.u32 %s4244_s20, 4  ;;  %s231_s21 = int_to_ptr.vmem [resolvable:$true] %s230_s21 }
  0x14   : > { %s256_s25 = sshll.u32 %s4683_s4, 4  ;;  %s4245_s26 = smov 64   ;;  %s257_s25 = int_to_ptr.hbm [resolvable:$true] %s256_s25 }
  0x15   : > { %p3917_p9 = pneg %p4348_p8  ;;  %s4246_s27 = smov 4  }
  0x16   : > { %s4247_s28 = smov [#allocation10]   ;;  %s242_s16 = sshll.u32 %s4682_s3, 4  ;;  %s243_s16 = int_to_ptr.hbm [resolvable:$true] %s242_s16 }
  0x17   : > { %p4356_p10 = pnand %p3917_p9, %p55_p1  ;;  %s258_s29 = sshll.u32 %s4247_s28, 4  ;;  %s259_s29 = int_to_ptr.vmem [resolvable:$true] %s258_s29 }
  0x18   : > { %s228_s18 = sshll.u32 %s4691_s2, 4  ;;  %s4248_s17 = smov [#allocation9]   ;;  %s229_s18 = int_to_ptr.hbm [resolvable:$true] %s228_s18 }
  0x19   : > { %3920 = dma.hbm_to_vmem [thread:$0]  (!%p4356_p10), %s229_s18, 20480, %s231_s21, [#allocation8], %s4245_s26, %s4245_s26, %s4246_s27  }
  0x1a   : > { %3926 = dma.hbm_to_vmem [thread:$0]  (!%p4356_p10), %s257_s25, 4096, %s259_s29, [#allocation11], %s4245_s26, %s4245_s26, %s4246_s27  }
  0x1b   : > { %s244_s20 = sshll.u32 %s4248_s17, 4  ;;  %s273_s23 = sshll.u32 %s4685_s6, 4  ;;  %s245_s20 = int_to_ptr.vmem [resolvable:$true] %s244_s20  ;;  %s274_s23 = int_to_ptr.hbm [resolvable:$true] %s273_s23 }
  0x1c   : > { %s4249_s24 = smov 16   ;;  %s4250_s28 = smov 1  }
  0x1d   : > { %3923 = dma.hbm_to_vmem [thread:$0]  (!%p4356_p10), %s243_s16, 64, %s245_s20, [#allocation8], %s4249_s24, %s4249_s24, %s4250_s28  }
  0x1e   : > { %s4251_s25 = smov [#allocation12]   ;;  %s4379_s30 = sadd.s32 1, %s4241_s12  }
  0x1f   : > { %s275_s29 = sshll.u32 %s4251_s25, 4  ;;  %s41_s13 = sadd.s32 1, %s4237_s11  ;;  %s276_s29 = int_to_ptr.vmem [resolvable:$true] %s275_s29 }
  0x20   : > { %3929 = dma.hbm_to_vmem [thread:$0]  (!%p4356_p10), %s274_s23, 1024, %s276_s29, [#allocation11], %s4245_s26, %s4245_s26, %s4246_s27  }
  0x21   : > { %s38_s17 = ssub.s32 %s4241_s12, %s4379_s30  ;;  %p48_p12 = scmp.ne.s32.totalorder %s4237_s11, %s4233_s10 }
  0x22   : > { %p39_p13 = scmp.eq.s32.totalorder %s38_s17, 0  ;;  %p49_p0 = scmp.eq.s32.totalorder %s4241_s12, 0 }
  0x23   : > { %p4389_p3 = por %p204_p2, %p48_p12  ;;  %p3942_p5 = scmp.lt.s32.totalorder %s4241_s12, 2 }
  0x24   : > { %s4395_s16 = scalar_select %p39_p13, %s4237_s11, %s41_s13  }
  0x25   : > { %p50_p7 = por %p49_p0, %p48_p12  ;;  %s292_s20 = sand.u32 1, %s4237_s11  }
  0x26   : > { %s2875_s22 = sshll.u32 %s292_s20, 4  ;;  %s3695_s26 = sshll.u32 %s4241_s12, 4 }
  0x27   : > { %s301_s23 = scalar_lea.hbm %s4680_s1, %s3695_s26  ;;  %s296_s24 = scalar_lea.vmem [#allocation4], %s2875_s22 }
  0x28   : > { %s304_s28 = sshll.u32 %s296_s24, 4  ;;  %s302_s25 = sshll.u32 %s301_s23, 4  ;;  %s305_s28 = int_to_ptr.vmem [resolvable:$true] %s304_s28  ;;  %s303_s25 = int_to_ptr.hbm [resolvable:$true] %s302_s25 }
  0x29   : > { %p4402_p2 = pnand %p3942_p5, %p50_p7  ;;  %s293_s13 = scalar_lea.sflag [#allocation5], %s292_s20 }
  0x2a   : > { %s4135_s17 = sshra.s32 %s303_s25, 4  ;;  %s4142_s27 = scalar_lea.hbm %s4680_s1, 32  ;;  %s4136_s17 = int_to_ptr.hbm [resolvable:$true] %s4135_s17 }
  0x2b   : > { %s4137_s2 = scalar_lea.hbm %s4136_s17, 16  ;;  %p4139_p10 = pneg %p4402_p2 }
  0x2c   : > { %p4138_p9 = scmp.ne.s32.totalorder %s4136_s17, %s4137_s2  ;;  %p4143_p0 = scmp.lt.s32.totalorder %s4136_s17, %s4680_s1 }
  0x2d   : > { %p4144_p5 = scmp.lt.s32.totalorder %s4142_s27, %s4137_s2 }
  0x2e   : > { %p4140_p12 = pnand %p4139_p10, %p4138_p9 }
  0x2f   : > { %p4145_p7 = por %p4144_p5, %p4143_p0 }
  0x30   : > { %p4141_p13 = pneg %p4140_p12 }
  0x32   : > { %p4146_p11 = pnand %p4145_p7, %p4141_p13 }
  0x34   : > { %4149 = shalt.err (!%p4146_p11)
}
  0x35   : > { %s4252_s20 = smov 128   ;;  %s4253_s24 = smov 8  }
  0x36   : > { %3933 = dma.hbm_to_vmem [thread:$0]  (!%p4402_p2), %s303_s25, 256, %s305_s28, %s293_s13, %s4252_s20, %s4252_s20, %s4253_s24  }
  0x37   : > { %316 = sbr.rel (%p4348_p8) target bundleno = 1502 (0x5de), region = 48  ;;  %s4419_s26 = sand.u32 (!%p4348_p8), 1, %s4233_s10  }
  0x38   : > { %s2879_s17 = sshll.u32 (!%p4348_p8), %s4419_s26, 4  ;;  %s319_s2 = scalar_lea.sflag (!%p4348_p8), [#allocation5], %s4419_s26 }
  0x39   : > { %s4425_s22 = scalar_lea.vmem (!%p4348_p8), [#allocation4], %s2879_s17 }
  0x3c   : > { %4212 = dma.done.wait (%p4335_p4), %s319_s2, 256  }
  0x3d   : > { %4214 = vsyncadd (%p4335_p4), %s319_s2, 4294967040 }
  0x3e   : > { %4216 = dma.done.wait (%p55_p1), [#allocation8], 20544  }
  0x3f   : > { %4218 = vsyncadd (%p55_p1), [#allocation8], 4294946752 }
  0x40   : > { %4220 = dma.done.wait (%p55_p1), [#allocation11], 5120  }
  0x41   : > { %4222 = vsyncadd (%p55_p1), [#allocation11], 4294962176  ;;  %v376_v0 = vlaneseq  ;;  %v3703_v1 = vld [vmem:[#allocation7 + $0x38] sm:$0xff]  ;;  %v3702_v6 = vld [vmem:[#allocation7 + $0x30] sm:$0xff]  ;;  %s379_s14 = sld [smem:[#allocation3 + %s4326_s0]]  ;;  %s3896_s2 = sshll.u32 %s4326_s0, 4 }
  0x42   : > { %v3719_v2 = vld [vmem:[#allocation7 + $0xb8] sm:$0xff]  ;;  %831 = vmatpush.bf16.msra.mxu0 %v3703_v1  ;;  %v3718_v7 = vld [vmem:[#allocation7 + $0xb0] sm:$0xff]  ;;  %v3701_v11 = vld [vmem:[#allocation7 + $0x28] sm:$0xff]  ;;  %s2753_s28 = scalar_lea.hbm %s4687_s8, %s3896_s2  ;;  %s2742_s0 = scalar_lea.sflag [#allocation6], %s4419_s26 }
  0x43   : > { %v4440_v3 = vshrl.u32 %v376_v0, 7  ;;  %v3727_v4 = vld [vmem:[#allocation7 + $0xf8] sm:$0xff]  ;;  %859 = vmatpush.bf16.msra.mxu2 %v3719_v2  ;;  %v3726_v8 = vld [vmem:[#allocation7 + $0xf0] sm:$0xff]  ;;  %v3717_v12 = vld [vmem:[#allocation7 + $0xa8] sm:$0xff]  ;;  %s2756_s29 = sshll.u32 %s2753_s28, 4  ;;  %s4185_s23 = scalar_lea.hbm %s4687_s8, 32  ;;  %s2757_s29 = int_to_ptr.hbm [resolvable:$true] %s2756_s29 }
  0x44   : > { %v3711_v5 = vld [vmem:[#allocation7 + $0x78] sm:$0xff]  ;;  %873 = vmatpush.bf16.msra.mxu3 %v3727_v4  ;;  %v3710_v9 = vld [vmem:[#allocation7 + $0x70] sm:$0xff]  ;;  %v3725_v13 = vld [vmem:[#allocation7 + $0xe8] sm:$0xff]  ;;  %s4179_s13 = sshra.s32 %s2757_s29, 4  ;;  %s4180_s13 = int_to_ptr.hbm [resolvable:$true] %s4179_s13 }
  0x45   : > { %845 = vmatpush.bf16.msra.mxu1 %v3711_v5  ;;  %v4443_v10 = vadd.s32 8, %v4440_v3  ;;  %v3709_v14 = vld [vmem:[#allocation7 + $0x68] sm:$0xff]  ;;  %v4446_v15 = vadd.s32 4294967294, %v4440_v3  ;;  %v3700_v17 = vld [vmem:[#allocation7 + $0x20] sm:$0xff]  ;;  %vm425_vm0 = vcmp.lt.s32.totalorder %v4440_v3, 2  ;;  %vm453_vm2 = vcmp.lt.s32.totalorder %v4440_v3, 7  ;;  %p4186_p11 = scmp.lt.s32.totalorder %s4180_s13, %s4687_s8 }
  0x46   : > { %832 = vmatpush.bf16.msra.mxu0 %v3702_v6  ;;  %v3716_v18 = vld [vmem:[#allocation7 + $0xa0] sm:$0xff]  ;;  %v4456_v22 = vld [vmem:[%s4425_s22 + $0x8] sm:$0xff]  ;;  %v4461_v23 = vadd.s32 4294967295, %v4440_v3  ;;  %vm438_vm4 = vcmp.lt.s32.totalorder %v4440_v3, 1  ;;  %v3698_v38 = vld [vmem:[#allocation7 + $0x10] sm:$0xff]  ;;  %vm466_vm6 = vcmp.lt.s32.totalorder %v4440_v3, 6 }
  0x47   : > { %860 = vmatpush.bf16.msra.mxu2 %v3718_v7  ;;  %v4449_v16 = vadd.s32 1, %v4443_v10  ;;  %v3724_v19 = vld [vmem:[#allocation7 + $0xe0] sm:$0xff]  ;;  %vm389_vm1 = vcmp.ge.s32.totalorder %v4446_v15, 0  ;;  %v3699_v24 = vld [vmem:[#allocation7 + $0x18] sm:$0xff]  ;;  %v4467_v27 = vmax.f32 %v4456_v22, 0.0  ;;  %v3714_v39 = vld [vmem:[#allocation7 + $0x90] sm:$0xff] }
  0x48   : > { %874 = vmatpush.bf16.msra.mxu3 %v3726_v8  ;;  %v3708_v20 = vld [vmem:[#allocation7 + $0x60] sm:$0xff]  ;;  %v3715_v25 = vld [vmem:[#allocation7 + $0x98] sm:$0xff]  ;;  %vm397_vm5 = vcmp.ge.s32.totalorder %v4461_v23, 0  ;;  %v3722_v42 = vld [vmem:[#allocation7 + $0xd0] sm:$0xff] }
  0x49   : > { %846 = vmatpush.bf16.msra.mxu1 %v3710_v9  ;;  %v4453_v21 = vld [vmem:[%s4425_s22] sm:$0xff]  ;;  %vm408_vm3 = vcmp.lt.s32.totalorder %v4449_v16, 16  ;;  %v424_v29 = vrot.slane %v4467_v27, 6  ;;  %v3723_v30 = vld [vmem:[#allocation7 + $0xd8] sm:$0xff]  ;;  %v452_v33 = vrot.slane %v4467_v27, 1  ;;  %v437_v35 = vrot.slane %v4467_v27, 7 }
  0x4a   : > { %833 = vmatpush.bf16.msra.mxu0 %v3701_v11  ;;  %v4464_v26 = vmax.f32 %v4453_v21, 0.0  ;;  %v3707_v31 = vld [vmem:[#allocation7 + $0x58] sm:$0xff]  ;;  %v3706_v43 = vld [vmem:[#allocation7 + $0x50] sm:$0xff]  ;;  %v450_v50 = vpack.c.bf16 %v4467_v27, %v4467_v27  ;;  %v3697_v53 = vld [vmem:[#allocation7 + $0x8] sm:$0xff]  ;;  %s373_s22 = scalar_lea.vmem [#allocation13], %s2879_s17  ;;  %s4181_s17 = scalar_lea.hbm %s4180_s13, 16 }
  0x4b   : > { %861 = vmatpush.bf16.msra.mxu2 %v3717_v12  ;;  %v3713_v54 = vld [vmem:[#allocation7 + $0x88] sm:$0xff]  ;;  %v3696_v2 = vld [vmem:[#allocation7] sm:$0xff]  ;;  %v3735_v7 = vld [vmem:[#allocation7 + $0x138] sm:$0xff]  ;;  %s2754_s25 = sshll.u32 %s373_s22, 4  ;;  %p4182_p1 = scmp.ne.s32.totalorder %s4180_s13, %s4181_s17  ;;  %s2755_s25 = int_to_ptr.vmem [resolvable:$true] %s2754_s25 }
  0x4c   : > { %875 = vmatpush.bf16.msra.mxu3 %v3725_v13  ;;  %v423_v28 = vrot.slane %v4464_v26, 6  ;;  %v451_v32 = vrot.slane %v4464_v26, 1  ;;  %v436_v34 = vrot.slane %v4464_v26, 7  ;;  %v449_v49 = vpack.c.bf16 %v4464_v26, %v4464_v26  ;;  %v3721_v57 = vld [vmem:[#allocation7 + $0xc8] sm:$0xff]  ;;  %v3712_v4 = vld [vmem:[#allocation7 + $0x80] sm:$0xff]  ;;  %p4187_p2 = scmp.lt.s32.totalorder %s4185_s23, %s4181_s17 }
  0x4d   : > { %847 = vmatpush.bf16.msra.mxu1 %v3709_v14  ;;  %v3705_v58 = vld [vmem:[#allocation7 + $0x48] sm:$0xff]  ;;  %v492_v62 = vunpack.c.l.b16 %v450_v50  ;;  %v3720_v8 = vld [vmem:[#allocation7 + $0xc0] sm:$0xff]  ;;  %v3767_v50 = vld [vmem:[#allocation7 + $0x1f8] sm:$0xff]  ;;  %p4183_p4 = pnand %p4182_p1, %p4389_p3 }
  0x4e   : > { %834 = vmatpush.bf16.msra.mxu0 %v3700_v17  ;;  %v427_v36 = vsel %vm425_vm0, %v424_v29, %v423_v28  ;;  %v455_v37 = vsel %vm453_vm2, %v452_v33, %v451_v32  ;;  %v426_v40 = vsel %vm425_vm0, %v423_v28, %v424_v29  ;;  %v454_v44 = vsel %vm453_vm2, %v451_v32, %v452_v33  ;;  %v3704_v12 = vld [vmem:[#allocation7 + $0x40] sm:$0xff]  ;;  %v3730_v32 = vld [vmem:[#allocation7 + $0x110] sm:$0xff]  ;;  %p4188_p9 = por %p4187_p2, %p4186_p11 }
  0x4f   : > { %862 = vmatpush.bf16.msra.mxu2 %v3716_v18  ;;  %v432_v41 = vsel %vm389_vm1, %v427_v36, 0.0  ;;  %v461_v45 = vsel %vm408_vm3, %v455_v37, 0.0  ;;  %v440_v46 = vsel %vm438_vm4, %v437_v35, %v436_v34  ;;  %v439_v47 = vsel %vm438_vm4, %v436_v34, %v437_v35  ;;  %v3734_v18 = vld [vmem:[#allocation7 + $0x130] sm:$0xff]  ;;  %p4184_p8 = pneg %p4183_p4 }
  0x50   : > { %876 = vmatpush.bf16.msra.mxu3 %v3724_v19  ;;  %v445_v48 = vsel %vm397_vm5, %v440_v46, 0.0  ;;  %v434_v51 = vpack.c.bf16 %v432_v41, %v432_v41  ;;  %v435_v52 = vpack.c.bf16 %v426_v40, %v426_v40  ;;  %v462_v55 = vpack.c.bf16 %v454_v44, %v454_v44  ;;  %v3743_v40 = vld [vmem:[#allocation10 + $0x38] sm:$0xff]  ;;  %v3742_v41 = vld [vmem:[#allocation10 + $0x30] sm:$0xff]  ;;  %v3737_v46 = vld [vmem:[#allocation10 + $0x8] sm:$0xff] }
  0x51   : > { %848 = vmatpush.bf16.msra.mxu1 %v3708_v20  ;;  %v463_v56 = vpack.c.bf16 %v461_v45, %v461_v45  ;;  %v447_v59 = vpack.c.bf16 %v445_v48, %v445_v48  ;;  %v448_v60 = vpack.c.bf16 %v439_v47, %v439_v47  ;;  %v491_v61 = vunpack.c.l.b16 %v449_v49  ;;  %v3733_v20 = vld [vmem:[#allocation7 + $0x128] sm:$0xff]  ;;  %v3739_v44 = vld [vmem:[#allocation10 + $0x18] sm:$0xff]  ;;  %v3738_v45 = vld [vmem:[#allocation10 + $0x10] sm:$0xff]  ;;  %p4189_p10 = pnand %p4188_p9, %p4184_p8 }
  0x52   : > { %835 = vmatpush.bf16.msra.mxu0 %v3699_v24  ;;  %v479_v63 = vunpack.c.l.b16 %v434_v51  ;;  %v480_v1 = vunpack.c.l.b16 %v435_v52  ;;  %v497_v5 = vunpack.c.l.b16 %v462_v55  ;;  %v3732_v24 = vld [vmem:[#allocation7 + $0x120] sm:$0xff]  ;;  %v464_v28 = vrot.slane %v4464_v26, 2  ;;  %v3751_v49 = vld [vmem:[#allocation7 + $0x178] sm:$0xff]  ;;  %v3750_v52 = vld [vmem:[#allocation7 + $0x170] sm:$0xff] }
  0x53   : > { %863 = vmatpush.bf16.msra.mxu2 %v3715_v25  ;;  %v498_v6 = vunpack.c.l.b16 %v463_v56  ;;  %v485_v9 = vunpack.c.l.b16 %v447_v59  ;;  %v486_v11 = vunpack.c.l.b16 %v448_v60  ;;  %v493_v13 = vpack.c.b16 %v492_v62, %v491_v61  ;;  %v3736_v47 = vld [vmem:[#allocation10] sm:$0xff]  ;;  %v3759_v51 = vld [vmem:[#allocation7 + $0x1b8] sm:$0xff]  ;;  %v3766_v55 = vld [vmem:[#allocation7 + $0x1f0] sm:$0xff] }
  0x54   : > { %877 = vmatpush.bf16.msra.mxu3 %v3723_v30  ;;  %v481_v14 = vpack.c.b16 %v480_v1, %v479_v63  ;;  %v4501_v25 = vadd.s32 2, %v4443_v10  ;;  %v465_v29 = vrot.slane %v4467_v27, 2  ;;  %v3731_v30 = vld [vmem:[#allocation7 + $0x118] sm:$0xff]  ;;  %v3729_v27 = vld [vmem:[#allocation7 + $0x108] sm:$0xff]  ;;  %v3994_v56 = vld [vmem:[#allocation9] ss:$0 sm:$0xff] }
  0x55   : > { %849 = vmatpush.bf16.msra.mxu1 %v3707_v31  ;;  %v499_v17 = vpack.c.b16 %v498_v6, %v497_v5  ;;  %v487_v19 = vpack.c.b16 %v486_v11, %v485_v9  ;;  %v3748_v61 = vld [vmem:[#allocation7 + $0x160] sm:$0xff] }
  0x56   : > { %836 = vmatpush.bf16.msra.mxu0 %v3698_v38  ;;  %vm416_vm7 = vcmp.lt.s32.totalorder %v4501_v25, 16  ;;  %v468_v31 = vsel %vm466_vm6, %v465_v29, %v464_v28  ;;  %v467_v33 = vsel %vm466_vm6, %v464_v28, %v465_v29  ;;  %v3728_v38 = vld [vmem:[#allocation7 + $0x100] sm:$0xff]  ;;  %v3758_v28 = vld [vmem:[#allocation7 + $0x1b0] sm:$0xff]  ;;  %v3765_v29 = vld [vmem:[#allocation7 + $0x1e8] sm:$0xff] }
  0x57   : > { %864 = vmatpush.bf16.msra.mxu2 %v3714_v39  ;;  %v474_v34 = vsel %vm416_vm7, %v468_v31, 0.0  ;;  %v475_v26 = vpack.c.bf16 %v467_v33, %v467_v33  ;;  %v3746_v31 = vld [vmem:[#allocation7 + $0x150] sm:$0xff]  ;;  %v3764_v33 = vld [vmem:[#allocation7 + $0x1e0] sm:$0xff] }
  0x58   : > { %878 = vmatpush.bf16.msra.mxu3 %v3722_v42  ;;  %v476_v35 = vpack.c.bf16 %v474_v34, %v474_v34  ;;  %v3741_v42 = vld [vmem:[#allocation10 + $0x28] sm:$0xff] }
  0x59   : > { %850 = vmatpush.bf16.msra.mxu1 %v3706_v43  ;;  %v503_v36 = vunpack.c.l.b16 %v475_v26  ;;  %v3740_v43 = vld [vmem:[#allocation10 + $0x20] sm:$0xff]  ;;  %v3881_v25 = vld [vmem:[#allocation10 + $0xc8] sm:$0xff] }
  0x5a   : > { %837 = vmatpush.bf16.msra.mxu0 %v3697_v53  ;;  %v504_v37 = vunpack.c.l.b16 %v476_v35  ;;  %v3775_v53 = vld [vmem:[#allocation7 + $0x238] sm:$0xff]  ;;  %v3773_v34 = vld [vmem:[#allocation7 + $0x228] sm:$0xff]  ;;  %v3756_v35 = vld [vmem:[#allocation7 + $0x1a0] sm:$0xff] }
  0x5b   : > { %865 = vmatpush.bf16.msra.mxu2 %v3713_v54  ;;  %v3745_v26 = vld [vmem:[#allocation7 + $0x148] sm:$0xff] }
  0x5c   : > { %879 = vmatpush.bf16.msra.mxu3 %v3721_v57  ;;  %v505_v39 = vpack.c.b16 %v504_v37, %v503_v36  ;;  %v3749_v57 = vld [vmem:[#allocation7 + $0x168] sm:$0xff]  ;;  %v3772_v36 = vld [vmem:[#allocation7 + $0x220] sm:$0xff] }
  0x5d   : > { %851 = vmatpush.bf16.msra.mxu1 %v3705_v58  ;;  %v3744_v37 = vld [vmem:[#allocation7 + $0x140] sm:$0xff] }
  0x5e   : > { %838 = vmatpush.bf16.msra.mxu0 %v3696_v2 }
  0x5f   : > { %866 = vmatpush.bf16.msra.mxu2 %v3712_v4  ;;  %v3747_v4 = vld [vmem:[#allocation7 + $0x158] sm:$0xff] }
  0x60   : > { %880 = vmatpush.bf16.msra.mxu3 %v3720_v8 }
  0x61   : > { %852 = vmatpush.bf16.msra.mxu1 %v3704_v12  ;;  %839 = vmatmul.bf16.vlgmr.msra.gmra.mxu0 %v481_v14 }
  0x62   : > { %887 = vmatpush.bf16.msrb.mxu0 %v3735_v7  ;;  %867 = vmatmul.bf16.vlgmr.msra.gmra.mxu2 %v493_v13 }
  0x63   : > { %881 = vmatmul.bf16.vlgmr.msra.gmra.mxu3 %v499_v17  ;;  %1382 = vmatpush.bf16.msrb.mxu2 %v3751_v49  ;;  %v3781_v49 = vld [vmem:[#allocation7 + $0x268] sm:$0xff] }
  0x64   : > { %853 = vmatmul.bf16.vlgmr.msra.gmra.mxu1 %v487_v19  ;;  %1396 = vmatpush.bf16.msrb.mxu3 %v3759_v51  ;;  %v3768_v51 = vld [vmem:[#allocation7 + $0x200] sm:$0xff] }
  0x65   : > { %972 = vmatpush.bf16.msrb.mxu1 %v3743_v40  ;;  %v3771_v40 = vld [vmem:[#allocation7 + $0x218] sm:$0xff] }
  0x66   : > { %888 = vmatpush.bf16.msrb.mxu0 %v3734_v18 }
  0x67   : > { %1383 = vmatpush.bf16.msrb.mxu2 %v3750_v52  ;;  %v3780_v52 = vld [vmem:[#allocation7 + $0x260] sm:$0xff] }
  0x68   : > { %1397 = vmatpush.bf16.msrb.mxu3 %v3758_v28 }
  0x69   : > { %973 = vmatpush.bf16.msrb.mxu1 %v3742_v41  ;;  %v3783_v41 = vld [vmem:[#allocation7 + $0x278] sm:$0xff] }
  0x6a   : > { %889 = vmatpush.bf16.msrb.mxu0 %v3733_v20 }
  0x6b   : > { %1384 = vmatpush.bf16.msrb.mxu2 %v3749_v57 }
  0x6d   : > { %974 = vmatpush.bf16.msrb.mxu1 %v3741_v42  ;;  %v3754_v42 = vld [vmem:[#allocation7 + $0x190] sm:$0xff] }
  0x6e   : > { %890 = vmatpush.bf16.msrb.mxu0 %v3732_v24 }
  0x6f   : > { %1385 = vmatpush.bf16.msrb.mxu2 %v3748_v61 }
  0x71   : > { %975 = vmatpush.bf16.msrb.mxu1 %v3740_v43  ;;  %v3761_v43 = vld [vmem:[#allocation7 + $0x1c8] sm:$0xff] }
  0x72   : > { %891 = vmatpush.bf16.msrb.mxu0 %v3731_v30  ;;  %v3774_v30 = vld [vmem:[#allocation7 + $0x230] sm:$0xff] }
  0x73   : > { %1386 = vmatpush.bf16.msrb.mxu2 %v3747_v4 }
  0x75   : > { %976 = vmatpush.bf16.msrb.mxu1 %v3739_v44  ;;  %v3770_v44 = vld [vmem:[#allocation7 + $0x210] sm:$0xff] }
  0x76   : > { %892 = vmatpush.bf16.msrb.mxu0 %v3730_v32  ;;  %v3757_v32 = vld [vmem:[#allocation7 + $0x1a8] sm:$0xff] }
  0x77   : > { %1387 = vmatpush.bf16.msrb.mxu2 %v3746_v31  ;;  %1398 = vmatpush.bf16.msrb.mxu3 %v3757_v32 }
  0x79   : > { %977 = vmatpush.bf16.msrb.mxu1 %v3738_v45  ;;  %v3782_v45 = vld [vmem:[#allocation7 + $0x270] sm:$0xff] }
  0x7a   : > { %893 = vmatpush.bf16.msrb.mxu0 %v3729_v27  ;;  %v3763_v27 = vld [vmem:[#allocation7 + $0x1d8] sm:$0xff] }
  0x7b   : > { %1388 = vmatpush.bf16.msrb.mxu2 %v3745_v26  ;;  %1399 = vmatpush.bf16.msrb.mxu3 %v3756_v35 }
  0x7d   : > { %978 = vmatpush.bf16.msrb.mxu1 %v3737_v46  ;;  %v3753_v46 = vld [vmem:[#allocation7 + $0x188] sm:$0xff] }
  0x7e   : > { %894 = vmatpush.bf16.msrb.mxu0 %v3728_v38  ;;  %v3755_v38 = vld [vmem:[#allocation7 + $0x198] sm:$0xff] }
  0x7f   : > { %1389 = vmatpush.bf16.msrb.mxu2 %v3744_v37  ;;  %1400 = vmatpush.bf16.msrb.mxu3 %v3755_v38 }
  0x81   : > { %895 = vmatmul.bf16.vlgmr.msrb.gmra.mxu0 %v505_v39  ;;  %979 = vmatpush.bf16.msrb.mxu1 %v3736_v47  ;;  %v3762_v39 = vld [vmem:[#allocation7 + $0x1d0] sm:$0xff]  ;;  %v3760_v47 = vld [vmem:[#allocation7 + $0x1c0] sm:$0xff] }
  0x82   : > { %1410 = vmatpush.bf16.msra.mxu0 %v3767_v50  ;;  %v3752_v50 = vld [vmem:[#allocation7 + $0x180] sm:$0xff] }
  0x83   : > { %1438 = vmatpush.bf16.msra.mxu2 %v3783_v41  ;;  %1401 = vmatpush.bf16.msrb.mxu3 %v3754_v42 }
  0x85   : > { %1424 = vmatpush.bf16.msra.mxu1 %v3775_v53  ;;  %v380_v53 = vstv %s379_s14 }
  0x86   : > { %1411 = vmatpush.bf16.msra.mxu0 %v3766_v55  ;;  %v3779_v55 = vld [vmem:[#allocation7 + $0x258] sm:$0xff]  ;;  %vm381_vm8 = vcmp.lt.s32.totalorder %v4440_v3, %v380_v53  ;;  %vm382_vm9 = vcmp.lt.s32.totalorder %v4443_v10, %v380_v53 }
  0x87   : > { %1439 = vmatpush.bf16.msra.mxu2 %v3782_v45  ;;  %1402 = vmatpush.bf16.msrb.mxu3 %v3753_v46  ;;  %v3882_v3 = vld [vmem:[#allocation10 + $0xd0] sm:$0xff] }
  0x89   : > { %1425 = vmatpush.bf16.msra.mxu1 %v3774_v30 }
  0x8a   : > { %1412 = vmatpush.bf16.msra.mxu0 %v3765_v29 }
  0x8b   : > { %1440 = vmatpush.bf16.msra.mxu2 %v3781_v49  ;;  %1403 = vmatpush.bf16.msrb.mxu3 %v3752_v50 }
  0x8d   : > { %1426 = vmatpush.bf16.msra.mxu1 %v3773_v34 }
  0x8e   : > { %1413 = vmatpush.bf16.msra.mxu0 %v3764_v33 }
  0x8f   : > { %1441 = vmatpush.bf16.msra.mxu2 %v3780_v52 }
  0x91   : > { %1427 = vmatpush.bf16.msra.mxu1 %v3772_v36 }
  0x92   : > { %1414 = vmatpush.bf16.msra.mxu0 %v3763_v27 }
  0x93   : > { %1442 = vmatpush.bf16.msra.mxu2 %v3779_v55 }
  0x95   : > { %1428 = vmatpush.bf16.msra.mxu1 %v3771_v40 }
  0x96   : > { %1415 = vmatpush.bf16.msra.mxu0 %v3762_v39 }
  0x99   : > { %1429 = vmatpush.bf16.msra.mxu1 %v3770_v44 }
  0x9a   : > { %1416 = vmatpush.bf16.msra.mxu0 %v3761_v43 }
  0x9e   : > { %1417 = vmatpush.bf16.msra.mxu0 %v3760_v47 }
  0xde   : > { %v840_v48 = vpop.f32.mrf.mxu0 }
  0xdf   : > { %v841_v60 = vadd.f32 %v3994_v56, %v840_v48  ;;  %v3769_v48 = vld [vmem:[#allocation7 + $0x208] sm:$0xff] }
  0xe0   : > { %1430 = vmatpush.bf16.msra.mxu1 %v3769_v48 }
  0xe1   : > { %v854_v54 = vpop.f32.mrf.mxu1 }
  0xe2   : > { %v855_v2 = vadd.f32 %v854_v54, %v841_v60  ;;  %v3995_v54 = vld [vmem:[%s4684_s5] ss:$0 sm:$0xff] }
  0xe4   : > { %1431 = vmatpush.bf16.msra.mxu1 %v3768_v51 }
  0xe5   : > { %v868_v58 = vpop.f32.mrf.mxu2 }
  0xe6   : > { %v842_v59 = vpop.f32.mrf.mxu0  ;;  %v882_v62 = vpop.f32.mrf.mxu3  ;;  %v869_v8 = vadd.f32 %v868_v58, %v855_v2 }
  0xe7   : > { %v843_v63 = vadd.f32 %v3994_v56, %v842_v59  ;;  %v3778_v56 = vld [vmem:[#allocation7 + $0x250] sm:$0xff]  ;;  %v4254_v59 = vmov 0.0  }
  0xe8   : > { %v883_v12 = vadd.f32 %v882_v62, %v869_v8  ;;  %v4518_v60 = vsel %vm381_vm8, 1.0, %v4254_v59  ;;  %1443 = vmatpush.bf16.msra.mxu2 %v3778_v56  ;;  %v3777_v62 = vld [vmem:[#allocation7 + $0x248] sm:$0xff] }
  0xe9   : > { %v856_v1 = vpop.f32.mrf.mxu1 }
  0xea   : > { %v857_v5 = vadd.f32 %v856_v1, %v843_v63  ;;  %v3776_v1 = vld [vmem:[#allocation7 + $0x240] sm:$0xff] }
  0xec   : > { %1444 = vmatpush.bf16.msra.mxu2 %v3777_v62  ;;  %v3789_v62 = vld [vmem:[#allocation10 + $0x68] sm:$0xff] }
  0xed   : > { %v870_v6 = vpop.f32.mrf.mxu2 }
  0xee   : > { %v871_v9 = vadd.f32 %v870_v6, %v857_v5  ;;  %v884_v11 = vpop.f32.mrf.mxu3  ;;  %v4526_v6 = vsel %vm382_vm9, 1.0, %v4254_v59  ;;  %v3791_v59 = vld [vmem:[#allocation10 + $0x78] sm:$0xff] }
  0xef   : > { %1525 = vmatpush.bf16.msra.mxu3 %v3791_v59  ;;  %v3810_v59 = vld [vmem:[#allocation7 + $0x310] sm:$0xff] }
  0xf0   : > { %v885_v13 = vadd.f32 %v884_v11, %v871_v9  ;;  %1445 = vmatpush.bf16.msra.mxu2 %v3776_v1  ;;  %v3788_v1 = vld [vmem:[#allocation10 + $0x60] sm:$0xff] }
  0xfe   : > { %v896_v7 = vpop.f32.mrf.mxu0 }
  0xff   : > { %v897_v14 = vadd.f32 %v896_v7, %v883_v12 }
 0x101   : > { %v901_v19 = vmax.f32 %v897_v14, 0.0 }
 0x106   : > { %v898_v17 = vpop.f32.mrf.mxu0 }
 0x107   : > { %v899_v18 = vadd.f32 %v898_v17, %v885_v13 }
 0x109   : > { %v902_v20 = vmax.f32 %v899_v18, 0.0 }
 0x10b   : > { %v903_v24 = vpack.c.bf16 %v902_v20, %v901_v19 }
 0x10d   : > { %980 = vmatmul.bf16.vlgmr.msrb.gmra.mxu1 %v903_v24 }
 0x18a   : > { %v981_v57 = vpop.f32.mrf.mxu1 }
 0x18b   : > { %v982_v58 = vadd.f32 %v3995_v54, %v981_v57 }
 0x18d   : > { %v986_v61 = vadd.f32 %v982_v58, %v4453_v21 }
 0x18f   : > { %v4522_v63 = vmul.f32 %v4518_v60, %v986_v61  ;;  %v3790_v61 = vld [vmem:[#allocation10 + $0x70] sm:$0xff] }
 0x190   : > { %1526 = vmatpush.bf16.msra.mxu3 %v3790_v61  ;;  %v3819_v61 = vld [vmem:[#allocation7 + $0x358] sm:$0xff] }
 0x191   : > { %v990_v5 = vmax.f32 %v4522_v63, 0.0 }
 0x192   : > { %v983_v2 = vpop.f32.mrf.mxu1 }
 0x193   : > { %v984_v4 = vadd.f32 %v3995_v54, %v983_v2  ;;  %v1008_v8 = vpack.c.bf16 %v990_v5, %v990_v5  ;;  %v992_v11 = vrot.slane %v990_v5, 6  ;;  %v1000_v12 = vrot.slane %v990_v5, 7  ;;  %v3787_v2 = vld [vmem:[#allocation10 + $0x58] sm:$0xff] }
 0x194   : > { %v1010_v19 = vrot.slane %v990_v5, 1  ;;  %v1018_v47 = vrot.slane %v990_v5, 2  ;;  %1527 = vmatpush.bf16.msra.mxu3 %v3789_v62  ;;  %v3785_v5 = vld [vmem:[#allocation10 + $0x48] sm:$0xff]  ;;  %v3831_v62 = vld [vmem:[#allocation7 + $0x3b8] sm:$0xff] }
 0x195   : > { %v987_v7 = vadd.f32 %v984_v4, %v4456_v22  ;;  %v1040_v18 = vunpack.c.l.b16 %v1008_v8  ;;  %v3786_v4 = vld [vmem:[#allocation10 + $0x50] sm:$0xff] }
 0x196   : > { %v3799_v8 = vld [vmem:[#allocation7 + $0x2b8] sm:$0xff] }
 0x197   : > { %v4530_v21 = vmul.f32 %v4526_v6, %v987_v7  ;;  %v3784_v7 = vld [vmem:[#allocation10 + $0x40] sm:$0xff]  ;;  %1935 = vmatpush.bf16.msrb.mxu0 %v3799_v8 }
 0x198   : > { %1528 = vmatpush.bf16.msra.mxu3 %v3788_v1  ;;  %v3802_v1 = vld [vmem:[#allocation7 + $0x2d0] sm:$0xff]  ;;  %v3808_v8 = vld [vmem:[#allocation7 + $0x300] sm:$0xff] }
 0x199   : > { %v991_v9 = vmax.f32 %v4530_v21, 0.0 }
 0x19b   : > { %v1009_v10 = vpack.c.bf16 %v991_v9, %v991_v9  ;;  %v993_v13 = vrot.slane %v991_v9, 6  ;;  %v1001_v14 = vrot.slane %v991_v9, 7  ;;  %v1011_v17 = vrot.slane %v991_v9, 1 }
 0x19c   : > { %v1019_v42 = vrot.slane %v991_v9, 2  ;;  %1529 = vmatpush.bf16.msra.mxu3 %v3787_v2  ;;  %v3809_v2 = vld [vmem:[#allocation7 + $0x308] sm:$0xff] }
 0x19d   : > { %v1041_v20 = vunpack.c.l.b16 %v1009_v10  ;;  %v994_v24 = vsel %vm425_vm0, %v992_v11, %v993_v13  ;;  %v995_v22 = vsel %vm425_vm0, %v993_v13, %v992_v11  ;;  %v1002_v28 = vsel %vm438_vm4, %v1000_v12, %v1001_v14  ;;  %v3815_v11 = vld [vmem:[#allocation7 + $0x338] sm:$0xff]  ;;  %v3798_v10 = vld [vmem:[#allocation7 + $0x2b0] sm:$0xff] }
 0x19e   : > { %v996_v29 = vsel %vm389_vm1, %v995_v22, 0.0  ;;  %v999_v30 = vpack.c.bf16 %v994_v24, %v994_v24  ;;  %v1003_v31 = vsel %vm438_vm4, %v1001_v14, %v1000_v12  ;;  %v1007_v32 = vpack.c.bf16 %v1002_v28, %v1002_v28  ;;  %v3807_v12 = vld [vmem:[#allocation7 + $0x2f8] sm:$0xff]  ;;  %v3814_v14 = vld [vmem:[#allocation7 + $0x330] sm:$0xff]  ;;  %1936 = vmatpush.bf16.msrb.mxu0 %v3798_v10  ;;  %v3796_v28 = vld [vmem:[#allocation7 + $0x2a0] sm:$0xff] }
 0x19f   : > { %v1042_v33 = vpack.c.b16 %v1041_v20, %v1040_v18  ;;  %v998_v34 = vpack.c.bf16 %v996_v29, %v996_v29  ;;  %v1004_v26 = vsel %vm397_vm5, %v1003_v31, 0.0  ;;  %v1012_v35 = vsel %vm453_vm2, %v1010_v19, %v1011_v17  ;;  %v3823_v13 = vld [vmem:[#allocation7 + $0x378] sm:$0xff]  ;;  %1949 = vmatpush.bf16.msrb.mxu1 %v3807_v12  ;;  %v3996_v18 = vld [vmem:[#allocation9 + $0x1] ss:$0 sm:$0xff] }
 0x1a0   : > { %v1029_v27 = vunpack.c.l.b16 %v999_v30  ;;  %v1006_v36 = vpack.c.bf16 %v1004_v26, %v1004_v26  ;;  %v1035_v37 = vunpack.c.l.b16 %v1007_v32  ;;  %v1013_v38 = vsel %vm453_vm2, %v1011_v17, %v1010_v19  ;;  %1530 = vmatpush.bf16.msra.mxu3 %v3786_v4  ;;  %v3797_v19 = vld [vmem:[#allocation7 + $0x2a8] sm:$0xff]  ;;  %v3795_v32 = vld [vmem:[#allocation7 + $0x298] sm:$0xff]  ;;  %v3818_v4 = vld [vmem:[#allocation7 + $0x350] sm:$0xff] }
 0x1a1   : > { %1418 = vmatmul.bf16.vlgmr.msra.gmra.mxu0 %v1042_v33  ;;  %v1028_v39 = vunpack.c.l.b16 %v998_v34  ;;  %v1015_v40 = vsel %vm408_vm3, %v1013_v38, 0.0  ;;  %v1016_v41 = vpack.c.bf16 %v1012_v35, %v1012_v35  ;;  %v1021_v50 = vsel %vm466_vm6, %v1019_v42, %v1018_v47  ;;  %v3800_v12 = vld [vmem:[#allocation7 + $0x2c0] sm:$0xff] }
 0x1a2   : > { %v1034_v43 = vunpack.c.l.b16 %v1006_v36  ;;  %v1017_v44 = vpack.c.bf16 %v1015_v40, %v1015_v40  ;;  %v1020_v52 = vsel %vm466_vm6, %v1018_v47, %v1019_v42  ;;  %v1023_v53 = vsel %vm416_vm7, %v1021_v50, 0.0  ;;  %1937 = vmatpush.bf16.msrb.mxu0 %v3797_v19  ;;  %v3813_v47 = vld [vmem:[#allocation7 + $0x328] sm:$0xff]  ;;  %v3816_v10 = vld [vmem:[#allocation7 + $0x340] sm:$0xff] }
 0x1a3   : > { %v1030_v45 = vpack.c.b16 %v1029_v27, %v1028_v39  ;;  %v1046_v46 = vunpack.c.l.b16 %v1016_v41  ;;  %v1024_v54 = vpack.c.bf16 %v1020_v52, %v1020_v52  ;;  %v1025_v55 = vpack.c.bf16 %v1023_v53, %v1023_v53  ;;  %v3805_v50 = vld [vmem:[#allocation7 + $0x2e8] sm:$0xff] }
 0x1a4   : > { %v1036_v48 = vpack.c.b16 %v1035_v37, %v1034_v43  ;;  %v1047_v49 = vunpack.c.l.b16 %v1017_v44  ;;  %1531 = vmatpush.bf16.msra.mxu3 %v3785_v5  ;;  %v3821_v52 = vld [vmem:[#allocation7 + $0x368] sm:$0xff]  ;;  %v3830_v5 = vld [vmem:[#allocation7 + $0x3b0] sm:$0xff] }
 0x1a5   : > { %1390 = vmatmul.bf16.vlgmr.msrb.gmra.mxu2 %v1030_v45  ;;  %v1052_v56 = vunpack.c.l.b16 %v1024_v54  ;;  %v1053_v57 = vunpack.c.l.b16 %v1025_v55  ;;  %v3793_v53 = vld [vmem:[#allocation7 + $0x288] sm:$0xff]  ;;  %v3804_v54 = vld [vmem:[#allocation7 + $0x2e0] sm:$0xff]  ;;  %v3811_v55 = vld [vmem:[#allocation7 + $0x318] sm:$0xff] }
 0x1a6   : > { %1404 = vmatmul.bf16.vlgmr.msrb.gmra.mxu3 %v1036_v48  ;;  %v1048_v51 = vpack.c.b16 %v1047_v49, %v1046_v46  ;;  %1963 = vmatpush.bf16.msrb.mxu2 %v3815_v11  ;;  %v3806_v46 = vld [vmem:[#allocation7 + $0x2f0] sm:$0xff]  ;;  %v3829_v11 = vld [vmem:[#allocation7 + $0x3a8] sm:$0xff] }
 0x1a7   : > { %v1054_v58 = vpack.c.b16 %v1053_v57, %v1052_v56  ;;  %1938 = vmatpush.bf16.msrb.mxu0 %v3796_v28  ;;  %v3822_v48 = vld [vmem:[#allocation7 + $0x370] sm:$0xff]  ;;  %1950 = vmatpush.bf16.msrb.mxu1 %v3806_v46  ;;  %v3820_v56 = vld [vmem:[#allocation7 + $0x360] sm:$0xff]  ;;  %v3825_v28 = vld [vmem:[#allocation7 + $0x388] sm:$0xff] }
 0x1a8   : > { %1432 = vmatmul.bf16.vlgmr.msra.gmra.mxu1 %v1048_v51  ;;  %1532 = vmatpush.bf16.msra.mxu3 %v3784_v7  ;;  %v3794_v49 = vld [vmem:[#allocation7 + $0x290] sm:$0xff]  ;;  %v3812_v51 = vld [vmem:[#allocation7 + $0x320] sm:$0xff]  ;;  %v3801_v7 = vld [vmem:[#allocation7 + $0x2c8] sm:$0xff] }
 0x1a9   : > { %v3792_v57 = vld [vmem:[#allocation7 + $0x280] sm:$0xff] }
 0x1aa   : > { %1964 = vmatpush.bf16.msrb.mxu2 %v3814_v14  ;;  %v3997_v14 = vld [vmem:[%s4684_s5 + $0x1] ss:$0 sm:$0xff] }
 0x1ab   : > { %1939 = vmatpush.bf16.msrb.mxu0 %v3795_v32  ;;  %1951 = vmatpush.bf16.msrb.mxu1 %v3805_v50  ;;  %v3824_v32 = vld [vmem:[#allocation7 + $0x380] sm:$0xff] }
 0x1ac   : > { %1977 = vmatpush.bf16.msrb.mxu3 %v3823_v13  ;;  %v3828_v13 = vld [vmem:[#allocation7 + $0x3a0] sm:$0xff] }
 0x1ae   : > { %1965 = vmatpush.bf16.msrb.mxu2 %v3813_v47 }
 0x1af   : > { %1940 = vmatpush.bf16.msrb.mxu0 %v3794_v49  ;;  %1952 = vmatpush.bf16.msrb.mxu1 %v3804_v54 }
 0x1b0   : > { %1978 = vmatpush.bf16.msrb.mxu3 %v3822_v48 }
 0x1b2   : > { %1966 = vmatpush.bf16.msrb.mxu2 %v3812_v51 }
 0x1b3   : > { %1941 = vmatpush.bf16.msrb.mxu0 %v3793_v53 }
 0x1b4   : > { %1979 = vmatpush.bf16.msrb.mxu3 %v3821_v52 }
 0x1b5   : > { %1446 = vmatmul.bf16.vlgmr.msra.gmra.mxu2 %v1054_v58  ;;  %v3803_v58 = vld [vmem:[#allocation7 + $0x2d8] sm:$0xff] }
 0x1b6   : > { %1967 = vmatpush.bf16.msrb.mxu2 %v3811_v55  ;;  %1953 = vmatpush.bf16.msrb.mxu1 %v3803_v58 }
 0x1b7   : > { %1942 = vmatpush.bf16.msrb.mxu0 %v3792_v57 }
 0x1b8   : > { %1980 = vmatpush.bf16.msrb.mxu3 %v3820_v56 }
 0x1ba   : > { %1968 = vmatpush.bf16.msrb.mxu2 %v3810_v59  ;;  %1954 = vmatpush.bf16.msrb.mxu1 %v3802_v1 }
 0x1bb   : > { %1991 = vmatpush.bf16.msra.mxu0 %v3831_v62 }
 0x1bc   : > { %1981 = vmatpush.bf16.msrb.mxu3 %v3819_v61 }
 0x1be   : > { %1969 = vmatpush.bf16.msrb.mxu2 %v3809_v2  ;;  %1955 = vmatpush.bf16.msrb.mxu1 %v3801_v7 }
 0x1bf   : > { %1992 = vmatpush.bf16.msra.mxu0 %v3830_v5 }
 0x1c0   : > { %1982 = vmatpush.bf16.msrb.mxu3 %v3818_v4 }
 0x1c2   : > { %1970 = vmatpush.bf16.msrb.mxu2 %v3808_v8  ;;  %1956 = vmatpush.bf16.msrb.mxu1 %v3800_v12 }
 0x1c3   : > { %1993 = vmatpush.bf16.msra.mxu0 %v3829_v11 }
 0x1c7   : > { %1994 = vmatpush.bf16.msra.mxu0 %v3828_v13 }
 0x21e   : > { %v1419_v20 = vpop.f32.mrf.mxu0 }
 0x225   : > { %v1433_v30 = vpop.f32.mrf.mxu1 }
 0x226   : > { %v1421_v27 = vpop.f32.mrf.mxu0 }
 0x228   : > { %v1391_v9 = vpop.f32.mrf.mxu2 }
 0x229   : > { %v1405_v17 = vpop.f32.mrf.mxu3  ;;  %v1392_v22 = vadd.f32 %v3996_v18, %v1391_v9  ;;  %v3817_v9 = vld [vmem:[#allocation7 + $0x348] sm:$0xff] }
 0x22a   : > { %1983 = vmatpush.bf16.msrb.mxu3 %v3817_v9 }
 0x22b   : > { %v1406_v31 = vadd.f32 %v1405_v17, %v1392_v22  ;;  %v3827_v17 = vld [vmem:[#allocation7 + $0x398] sm:$0xff] }
 0x22c   : > { %1995 = vmatpush.bf16.msra.mxu0 %v3827_v17 }
 0x22d   : > { %v1420_v35 = vadd.f32 %v1419_v20, %v1406_v31  ;;  %v1435_v38 = vpop.f32.mrf.mxu1  ;;  %v3826_v20 = vld [vmem:[#allocation7 + $0x390] sm:$0xff] }
 0x22e   : > { %1984 = vmatpush.bf16.msrb.mxu3 %v3816_v10 }
 0x22f   : > { %v1434_v37 = vadd.f32 %v1433_v30, %v1420_v35 }
 0x230   : > { %v1393_v24 = vpop.f32.mrf.mxu2  ;;  %1996 = vmatpush.bf16.msra.mxu0 %v3826_v20  ;;  %v3839_v20 = vld [vmem:[#allocation10 + $0xb8] sm:$0xff] }
 0x231   : > { %v1394_v29 = vadd.f32 %v3996_v18, %v1393_v24  ;;  %v1407_v33 = vpop.f32.mrf.mxu3  ;;  %2078 = vmatpush.bf16.msra.mxu1 %v3839_v20  ;;  %v3858_v20 = vld [vmem:[#allocation7 + $0x450] sm:$0xff] }
 0x233   : > { %v1408_v34 = vadd.f32 %v1407_v33, %v1394_v29 }
 0x234   : > { %1997 = vmatpush.bf16.msra.mxu0 %v3825_v28  ;;  %v3837_v28 = vld [vmem:[#allocation10 + $0xa8] sm:$0xff] }
 0x235   : > { %v1422_v36 = vadd.f32 %v1421_v27, %v1408_v34 }
 0x237   : > { %v1436_v40 = vadd.f32 %v1435_v38, %v1422_v36 }
 0x238   : > { %v1447_v26 = vpop.f32.mrf.mxu2  ;;  %1998 = vmatpush.bf16.msra.mxu0 %v3824_v32  ;;  %v3833_v32 = vld [vmem:[#allocation10 + $0x88] sm:$0xff] }
 0x239   : > { %v1448_v39 = vadd.f32 %v1447_v26, %v1434_v37 }
 0x23b   : > { %v1452_v43 = vmax.f32 %v1448_v39, 0.0 }
 0x240   : > { %v1449_v41 = vpop.f32.mrf.mxu2 }
 0x241   : > { %v1450_v42 = vadd.f32 %v1449_v41, %v1436_v40 }
 0x243   : > { %v1453_v44 = vmax.f32 %v1450_v42, 0.0 }
 0x245   : > { %v1454_v45 = vpack.c.bf16 %v1453_v44, %v1452_v43 }
 0x247   : > { %1533 = vmatmul.bf16.vlgmr.msra.gmra.mxu3 %v1454_v45 }
 0x2ca   : > { %v1534_v18 = vpop.f32.mrf.mxu3 }
 0x2cb   : > { %v1535_v19 = vadd.f32 %v3997_v14, %v1534_v18 }
 0x2cd   : > { %v1539_v24 = vadd.f32 %v1535_v19, %v4522_v63 }
 0x2cf   : > { %v4562_v22 = vmul.f32 %v4518_v60, %v1539_v24  ;;  %v3838_v24 = vld [vmem:[#allocation10 + $0xb0] sm:$0xff] }
 0x2d0   : > { %2079 = vmatpush.bf16.msra.mxu1 %v3838_v24  ;;  %v3867_v24 = vld [vmem:[#allocation7 + $0x498] sm:$0xff] }
 0x2d1   : > { %v1543_v31 = vmax.f32 %v4562_v22, 0.0 }
 0x2d2   : > { %v1536_v29 = vpop.f32.mrf.mxu3 }
 0x2d3   : > { %v1537_v30 = vadd.f32 %v3997_v14, %v1536_v29  ;;  %v1561_v26 = vpack.c.bf16 %v1543_v31, %v1543_v31  ;;  %v1545_v35 = vrot.slane %v1543_v31, 6  ;;  %v1553_v27 = vrot.slane %v1543_v31, 7  ;;  %v3836_v29 = vld [vmem:[#allocation10 + $0xa0] sm:$0xff] }
 0x2d4   : > { %v1563_v41 = vrot.slane %v1543_v31, 1  ;;  %v1571_v5 = vrot.slane %v1543_v31, 2  ;;  %2080 = vmatpush.bf16.msra.mxu1 %v3837_v28  ;;  %v3834_v31 = vld [vmem:[#allocation10 + $0x90] sm:$0xff] }
 0x2d5   : > { %v1540_v33 = vadd.f32 %v1537_v30, %v4530_v21  ;;  %v1593_v40 = vunpack.c.l.b16 %v1561_v26  ;;  %v3835_v30 = vld [vmem:[#allocation10 + $0x98] sm:$0xff] }
 0x2d6   : > { %v3847_v26 = vld [vmem:[#allocation7 + $0x3f8] sm:$0xff] }
 0x2d7   : > { %v4567_v34 = vmul.f32 %v4526_v6, %v1540_v33  ;;  %v3832_v33 = vld [vmem:[#allocation10 + $0x80] sm:$0xff]  ;;  %2488 = vmatpush.bf16.msra.mxu2 %v3847_v26  ;;  %v3879_v28 = vld [vmem:[#allocation7 + $0x4f8] sm:$0xff] }
 0x2d8   : > { %2081 = vmatpush.bf16.msra.mxu1 %v3836_v29  ;;  %v3850_v29 = vld [vmem:[#allocation7 + $0x410] sm:$0xff]  ;;  %v3856_v26 = vld [vmem:[#allocation7 + $0x440] sm:$0xff] }
 0x2d9   : > { %v1544_v63 = vmax.f32 %v4567_v34, 0.0 }
 0x2db   : > { %v1562_v36 = vpack.c.bf16 %v1544_v63, %v1544_v63  ;;  %v1546_v37 = vrot.slane %v1544_v63, 6  ;;  %v1554_v38 = vrot.slane %v1544_v63, 7  ;;  %v1564_v39 = vrot.slane %v1544_v63, 1 }
 0x2dc   : > { %v1572_v61 = vrot.slane %v1544_v63, 2  ;;  %2082 = vmatpush.bf16.msra.mxu1 %v3835_v30  ;;  %v3857_v30 = vld [vmem:[#allocation7 + $0x448] sm:$0xff] }
 0x2dd   : > { %v1594_v42 = vunpack.c.l.b16 %v1562_v36  ;;  %v1547_v43 = vsel %vm425_vm0, %v1545_v35, %v1546_v37  ;;  %v1548_v21 = vsel %vm425_vm0, %v1546_v37, %v1545_v35  ;;  %v1555_v44 = vsel %vm438_vm4, %v1553_v27, %v1554_v38  ;;  %v3863_v35 = vld [vmem:[#allocation7 + $0x478] sm:$0xff]  ;;  %v3846_v36 = vld [vmem:[#allocation7 + $0x3f0] sm:$0xff] }
 0x2de   : > { %v1549_v45 = vsel %vm389_vm1, %v1548_v21, 0.0  ;;  %v1552_v46 = vpack.c.bf16 %v1547_v43, %v1547_v43  ;;  %v1556_v47 = vsel %vm438_vm4, %v1554_v38, %v1553_v27  ;;  %v1560_v48 = vpack.c.bf16 %v1555_v44, %v1555_v44  ;;  %v3855_v27 = vld [vmem:[#allocation7 + $0x438] sm:$0xff]  ;;  %v3862_v38 = vld [vmem:[#allocation7 + $0x470] sm:$0xff]  ;;  %2489 = vmatpush.bf16.msra.mxu2 %v3846_v36  ;;  %v3844_v44 = vld [vmem:[#allocation7 + $0x3e0] sm:$0xff] }
 0x2df   : > { %v1595_v49 = vpack.c.b16 %v1594_v42, %v1593_v40  ;;  %v1551_v50 = vpack.c.bf16 %v1549_v45, %v1549_v45  ;;  %v1557_v51 = vsel %vm397_vm5, %v1556_v47, 0.0  ;;  %v1565_v52 = vsel %vm453_vm2, %v1563_v41, %v1564_v39  ;;  %v3871_v37 = vld [vmem:[#allocation7 + $0x4b8] sm:$0xff]  ;;  %2502 = vmatpush.bf16.msra.mxu3 %v3855_v27  ;;  %v3998_v40 = vld [vmem:[#allocation9 + $0x2] ss:$0 sm:$0xff] }
 0x2e0   : > { %v1582_v53 = vunpack.c.l.b16 %v1552_v46  ;;  %v1559_v54 = vpack.c.bf16 %v1557_v51, %v1557_v51  ;;  %v1588_v55 = vunpack.c.l.b16 %v1560_v48  ;;  %v1566_v56 = vsel %vm453_vm2, %v1564_v39, %v1563_v41  ;;  %2083 = vmatpush.bf16.msra.mxu1 %v3834_v31  ;;  %v3845_v41 = vld [vmem:[#allocation7 + $0x3e8] sm:$0xff]  ;;  %v3843_v48 = vld [vmem:[#allocation7 + $0x3d8] sm:$0xff]  ;;  %v3866_v31 = vld [vmem:[#allocation7 + $0x490] sm:$0xff] }
 0x2e1   : > { %1971 = vmatmul.bf16.vlgmr.msrb.gmra.mxu2 %v1595_v49  ;;  %v1581_v57 = vunpack.c.l.b16 %v1551_v50  ;;  %v1568_v58 = vsel %vm408_vm3, %v1566_v56, 0.0  ;;  %v1569_v59 = vpack.c.bf16 %v1565_v52, %v1565_v52  ;;  %v1574_v9 = vsel %vm466_vm6, %v1572_v61, %v1571_v5  ;;  %v3848_v27 = vld [vmem:[#allocation7 + $0x400] sm:$0xff] }
 0x2e2   : > { %v1587_v62 = vunpack.c.l.b16 %v1559_v54  ;;  %v1570_v1 = vpack.c.bf16 %v1568_v58, %v1568_v58  ;;  %v1573_v12 = vsel %vm466_vm6, %v1571_v5, %v1572_v61  ;;  %v1576_v10 = vsel %vm416_vm7, %v1574_v9, 0.0  ;;  %2490 = vmatpush.bf16.msra.mxu2 %v3845_v41  ;;  %v3861_v5 = vld [vmem:[#allocation7 + $0x468] sm:$0xff]  ;;  %v3864_v36 = vld [vmem:[#allocation7 + $0x480] sm:$0xff] }
 0x2e3   : > { %v1583_v2 = vpack.c.b16 %v1582_v53, %v1581_v57  ;;  %v1599_v4 = vunpack.c.l.b16 %v1569_v59  ;;  %v1577_v13 = vpack.c.bf16 %v1573_v12, %v1573_v12  ;;  %v1578_v14 = vpack.c.bf16 %v1576_v10, %v1576_v10  ;;  %v3853_v9 = vld [vmem:[#allocation7 + $0x428] sm:$0xff] }
 0x2e4   : > { %v1589_v7 = vpack.c.b16 %v1588_v55, %v1587_v62  ;;  %v1600_v8 = vunpack.c.l.b16 %v1570_v1  ;;  %2084 = vmatpush.bf16.msra.mxu1 %v3833_v32  ;;  %v3869_v12 = vld [vmem:[#allocation7 + $0x4a8] sm:$0xff]  ;;  %v3878_v32 = vld [vmem:[#allocation7 + $0x4f0] sm:$0xff] }
 0x2e5   : > { %1943 = vmatmul.bf16.vlgmr.msrb.gmra.mxu0 %v1583_v2  ;;  %v1605_v17 = vunpack.c.l.b16 %v1577_v13  ;;  %v1606_v18 = vunpack.c.l.b16 %v1578_v14  ;;  %v3841_v10 = vld [vmem:[#allocation7 + $0x3c8] sm:$0xff]  ;;  %v3852_v13 = vld [vmem:[#allocation7 + $0x420] sm:$0xff]  ;;  %v3859_v14 = vld [vmem:[#allocation7 + $0x458] sm:$0xff] }
 0x2e6   : > { %1957 = vmatmul.bf16.vlgmr.msrb.gmra.mxu1 %v1589_v7  ;;  %v1601_v11 = vpack.c.b16 %v1600_v8, %v1599_v4  ;;  %2516 = vmatpush.bf16.msrb.mxu0 %v3863_v35  ;;  %v3854_v4 = vld [vmem:[#allocation7 + $0x430] sm:$0xff]  ;;  %v3877_v35 = vld [vmem:[#allocation7 + $0x4e8] sm:$0xff] }
 0x2e7   : > { %v1607_v19 = vpack.c.b16 %v1606_v18, %v1605_v17  ;;  %2491 = vmatpush.bf16.msra.mxu2 %v3844_v44  ;;  %v3870_v7 = vld [vmem:[#allocation7 + $0x4b0] sm:$0xff]  ;;  %2503 = vmatpush.bf16.msra.mxu3 %v3854_v4  ;;  %v3868_v17 = vld [vmem:[#allocation7 + $0x4a0] sm:$0xff]  ;;  %v3873_v44 = vld [vmem:[#allocation7 + $0x4c8] sm:$0xff] }
 0x2e8   : > { %1985 = vmatmul.bf16.vlgmr.msrb.gmra.mxu3 %v1601_v11  ;;  %2085 = vmatpush.bf16.msra.mxu1 %v3832_v33  ;;  %v3842_v8 = vld [vmem:[#allocation7 + $0x3d0] sm:$0xff]  ;;  %v3860_v11 = vld [vmem:[#allocation7 + $0x460] sm:$0xff]  ;;  %v3849_v33 = vld [vmem:[#allocation7 + $0x408] sm:$0xff] }
 0x2e9   : > { %v3840_v18 = vld [vmem:[#allocation7 + $0x3c0] sm:$0xff] }
 0x2ea   : > { %2517 = vmatpush.bf16.msrb.mxu0 %v3862_v38  ;;  %v3999_v38 = vld [vmem:[%s4684_s5 + $0x2] ss:$0 sm:$0xff] }
 0x2eb   : > { %2492 = vmatpush.bf16.msra.mxu2 %v3843_v48  ;;  %2504 = vmatpush.bf16.msra.mxu3 %v3853_v9  ;;  %v3872_v48 = vld [vmem:[#allocation7 + $0x4c0] sm:$0xff] }
 0x2ec   : > { %2530 = vmatpush.bf16.msrb.mxu1 %v3871_v37  ;;  %v3876_v37 = vld [vmem:[#allocation7 + $0x4e0] sm:$0xff] }
 0x2ee   : > { %2518 = vmatpush.bf16.msrb.mxu0 %v3861_v5 }
 0x2ef   : > { %2493 = vmatpush.bf16.msra.mxu2 %v3842_v8  ;;  %2505 = vmatpush.bf16.msra.mxu3 %v3852_v13 }
 0x2f0   : > { %2531 = vmatpush.bf16.msrb.mxu1 %v3870_v7 }
 0x2f2   : > { %2519 = vmatpush.bf16.msrb.mxu0 %v3860_v11 }
 0x2f3   : > { %2494 = vmatpush.bf16.msra.mxu2 %v3841_v10 }
 0x2f4   : > { %2532 = vmatpush.bf16.msrb.mxu1 %v3869_v12 }
 0x2f5   : > { %1999 = vmatmul.bf16.vlgmr.msra.gmra.mxu0 %v1607_v19  ;;  %v3851_v19 = vld [vmem:[#allocation7 + $0x418] sm:$0xff] }
 0x2f6   : > { %2520 = vmatpush.bf16.msrb.mxu0 %v3859_v14  ;;  %2506 = vmatpush.bf16.msra.mxu3 %v3851_v19 }
 0x2f7   : > { %2495 = vmatpush.bf16.msra.mxu2 %v3840_v18 }
 0x2f8   : > { %2533 = vmatpush.bf16.msrb.mxu1 %v3868_v17 }
 0x2fa   : > { %2521 = vmatpush.bf16.msrb.mxu0 %v3858_v20  ;;  %2507 = vmatpush.bf16.msra.mxu3 %v3850_v29 }
 0x2fb   : > { %2544 = vmatpush.bf16.msrb.mxu2 %v3879_v28 }
 0x2fc   : > { %2534 = vmatpush.bf16.msrb.mxu1 %v3867_v24 }
 0x2fe   : > { %2522 = vmatpush.bf16.msrb.mxu0 %v3857_v30  ;;  %2508 = vmatpush.bf16.msra.mxu3 %v3849_v33 }
 0x2ff   : > { %2545 = vmatpush.bf16.msrb.mxu2 %v3878_v32 }
 0x300   : > { %2535 = vmatpush.bf16.msrb.mxu1 %v3866_v31 }
 0x302   : > { %2523 = vmatpush.bf16.msrb.mxu0 %v3856_v26  ;;  %2509 = vmatpush.bf16.msra.mxu3 %v3848_v27 }
 0x303   : > { %2546 = vmatpush.bf16.msrb.mxu2 %v3877_v35 }
 0x307   : > { %2547 = vmatpush.bf16.msrb.mxu2 %v3876_v37 }
 0x362   : > { %v1944_v63 = vpop.f32.mrf.mxu0 }
 0x363   : > { %v1958_v39 = vpop.f32.mrf.mxu1  ;;  %v1945_v21 = vadd.f32 %v3998_v40, %v1944_v63  ;;  %v3865_v63 = vld [vmem:[#allocation7 + $0x488] sm:$0xff] }
 0x364   : > { %v1972_v42 = vpop.f32.mrf.mxu2  ;;  %2536 = vmatpush.bf16.msrb.mxu1 %v3865_v63 }
 0x365   : > { %v1959_v47 = vadd.f32 %v1958_v39, %v1945_v21  ;;  %v3875_v39 = vld [vmem:[#allocation7 + $0x4d8] sm:$0xff] }
 0x366   : > { %2548 = vmatpush.bf16.msrb.mxu2 %v3875_v39  ;;  %v3887_v39 = vld [vmem:[#allocation10 + $0xf8] sm:$0xff] }
 0x367   : > { %v1973_v52 = vadd.f32 %v1972_v42, %v1959_v47  ;;  %v3874_v42 = vld [vmem:[#allocation7 + $0x4d0] sm:$0xff]  ;;  %2631 = vmatpush.bf16.msrb.mxu3 %v3887_v39 }
 0x368   : > { %2537 = vmatpush.bf16.msrb.mxu1 %v3864_v36 }
 0x36a   : > { %v1946_v43 = vpop.f32.mrf.mxu0  ;;  %2549 = vmatpush.bf16.msrb.mxu2 %v3874_v42  ;;  %v3884_v42 = vld [vmem:[#allocation10 + $0xe0] sm:$0xff] }
 0x36b   : > { %v1986_v45 = vpop.f32.mrf.mxu3  ;;  %v1947_v46 = vadd.f32 %v3998_v40, %v1946_v43  ;;  %v1960_v49 = vpop.f32.mrf.mxu1 }
 0x36c   : > { %v1974_v53 = vpop.f32.mrf.mxu2  ;;  %v1987_v56 = vadd.f32 %v1986_v45, %v1973_v52 }
 0x36d   : > { %v1961_v50 = vadd.f32 %v1960_v49, %v1947_v46 }
 0x36e   : > { %2550 = vmatpush.bf16.msrb.mxu2 %v3873_v44  ;;  %v3880_v44 = vld [vmem:[#allocation10 + $0xc0] sm:$0xff] }
 0x36f   : > { %v1975_v54 = vadd.f32 %v1974_v53, %v1961_v50 }
 0x372   : > { %v2000_v51 = vpop.f32.mrf.mxu0  ;;  %2551 = vmatpush.bf16.msrb.mxu2 %v3872_v48 }
 0x373   : > { %v1988_v55 = vpop.f32.mrf.mxu3  ;;  %v2001_v58 = vadd.f32 %v2000_v51, %v1987_v56 }
 0x374   : > { %v1989_v57 = vadd.f32 %v1988_v55, %v1975_v54 }
 0x375   : > { %v2005_v62 = vmax.f32 %v2001_v58, 0.0 }
 0x37a   : > { %v2002_v59 = vpop.f32.mrf.mxu0 }
 0x37b   : > { %v2003_v61 = vadd.f32 %v2002_v59, %v1989_v57 }
 0x37d   : > { %v2006_v1 = vmax.f32 %v2003_v61, 0.0 }
 0x37f   : > { %v2007_v2 = vpack.c.bf16 %v2006_v1, %v2005_v62 }
 0x381   : > { %2086 = vmatmul.bf16.vlgmr.msra.gmra.mxu1 %v2007_v2 }
 0x3fe   : > { %v2087_v40 = vpop.f32.mrf.mxu1 }
 0x3ff   : > { %v2088_v41 = vadd.f32 %v3999_v38, %v2087_v40  ;;  %v3886_v40 = vld [vmem:[#allocation10 + $0xf0] sm:$0xff] }
 0x400   : > { %2632 = vmatpush.bf16.msrb.mxu3 %v3886_v40 }
 0x401   : > { %v2092_v43 = vadd.f32 %v2088_v41, %v4562_v22  ;;  %v3885_v41 = vld [vmem:[#allocation10 + $0xe8] sm:$0xff] }
 0x403   : > { %v4599_v21 = vmul.f32 %v4518_v60, %v2092_v43  ;;  %v3883_v43 = vld [vmem:[#allocation10 + $0xd8] sm:$0xff] }
 0x404   : > { %2633 = vmatpush.bf16.msrb.mxu3 %v3885_v41 }
 0x405   : > { %v2096_v47 = vmax.f32 %v4599_v21, 0.0 }
 0x406   : > { %v2089_v45 = vpop.f32.mrf.mxu1 }
 0x407   : > { %v2090_v46 = vadd.f32 %v3999_v38, %v2089_v45  ;;  %v2114_v51 = vpack.c.bf16 %v2096_v47, %v2096_v47  ;;  %v2098_v52 = vrot.slane %v2096_v47, 6  ;;  %v2106_v53 = vrot.slane %v2096_v47, 7  ;;  %v3895_v45 = vld [vmem:[#allocation12 + $0x38] sm:$0xff] }
 0x408   : > { %v2116_v59 = vrot.slane %v2096_v47, 1  ;;  %v2124_v30 = vrot.slane %v2096_v47, 2  ;;  %2634 = vmatpush.bf16.msrb.mxu3 %v3884_v42  ;;  %2718 = vmatpush.bf16.msra.mxu0 %v3895_v45  ;;  %v3894_v47 = vld [vmem:[#allocation12 + $0x30] sm:$0xff] }
 0x409   : > { %v2093_v49 = vadd.f32 %v2090_v46, %v4567_v34  ;;  %v2146_v58 = vunpack.c.l.b16 %v2114_v51  ;;  %v3893_v51 = vld [vmem:[#allocation12 + $0x28] sm:$0xff] }
 0x40b   : > { %v4604_v50 = vmul.f32 %v4526_v6, %v2093_v49  ;;  %v4000_v49 = vld [vmem:[#allocation9 + $0x3] ss:$0 sm:$0xff] }
 0x40c   : > { %2635 = vmatpush.bf16.msrb.mxu3 %v3883_v43  ;;  %2719 = vmatpush.bf16.msra.mxu0 %v3894_v47 }
 0x40d   : > { %v2097_v22 = vmax.f32 %v4604_v50, 0.0 }
 0x40f   : > { %v2115_v54 = vpack.c.bf16 %v2097_v22, %v2097_v22  ;;  %v2099_v55 = vrot.slane %v2097_v22, 6  ;;  %v2107_v56 = vrot.slane %v2097_v22, 7  ;;  %v2117_v57 = vrot.slane %v2097_v22, 1 }
 0x410   : > { %v2125_v20 = vrot.slane %v2097_v22, 2  ;;  %2636 = vmatpush.bf16.msrb.mxu3 %v3882_v3  ;;  %2720 = vmatpush.bf16.msra.mxu0 %v3893_v51 }
 0x411   : > { %v2147_v61 = vunpack.c.l.b16 %v2115_v54  ;;  %v2100_v62 = vsel %vm425_vm0, %v2098_v52, %v2099_v55  ;;  %v2101_v34 = vsel %vm425_vm0, %v2099_v55, %v2098_v52  ;;  %v2108_v1 = vsel %vm438_vm4, %v2106_v53, %v2107_v56  ;;  %v3892_v54 = vld [vmem:[#allocation12 + $0x20] sm:$0xff] }
 0x412   : > { %v2102_v2 = vsel %vm389_vm1, %v2101_v34, 0.0  ;;  %v2105_v4 = vpack.c.bf16 %v2100_v62, %v2100_v62  ;;  %v2109_v5 = vsel %vm438_vm4, %v2107_v56, %v2106_v53  ;;  %v2113_v7 = vpack.c.bf16 %v2108_v1, %v2108_v1 }
 0x413   : > { %v2148_v8 = vpack.c.b16 %v2147_v61, %v2146_v58  ;;  %v2104_v9 = vpack.c.bf16 %v2102_v2, %v2102_v2  ;;  %v2110_v11 = vsel %vm397_vm5, %v2109_v5, 0.0  ;;  %v2118_v12 = vsel %vm453_vm2, %v2116_v59, %v2117_v57 }
 0x414   : > { %v2135_v10 = vunpack.c.l.b16 %v2105_v4  ;;  %v2112_v13 = vpack.c.bf16 %v2110_v11, %v2110_v11  ;;  %v2141_v14 = vunpack.c.l.b16 %v2113_v7  ;;  %v2119_v15 = vsel %vm453_vm2, %v2117_v57, %v2116_v59  ;;  %2637 = vmatpush.bf16.msrb.mxu3 %v3881_v25  ;;  %2721 = vmatpush.bf16.msra.mxu0 %v3892_v54 }
 0x415   : > { %2524 = vmatmul.bf16.vlgmr.msrb.gmra.mxu0 %v2148_v8  ;;  %v2134_v17 = vunpack.c.l.b16 %v2104_v9  ;;  %v2121_v18 = vsel %vm408_vm3, %v2119_v15, 0.0  ;;  %v2122_v19 = vpack.c.bf16 %v2118_v12, %v2118_v12  ;;  %v2127_v33 = vsel %vm466_vm6, %v2125_v20, %v2124_v30  ;;  %v3889_v15 = vld [vmem:[#allocation12 + $0x8] sm:$0xff] }
 0x416   : > { %v2140_v24 = vunpack.c.l.b16 %v2112_v13  ;;  %v2123_v28 = vpack.c.bf16 %v2121_v18, %v2121_v18  ;;  %v2126_v16 = vsel %vm466_vm6, %v2124_v30, %v2125_v20  ;;  %v2129_v63 = vsel %vm416_vm7, %v2127_v33, 0.0  ;;  %v3891_v13 = vld [vmem:[#allocation12 + $0x18] sm:$0xff]  ;;  %v4002_v33 = vld [vmem:[%s4686_s7] ss:$0 sm:$0xff] }
 0x417   : > { %v2136_v23 = vpack.c.b16 %v2135_v10, %v2134_v17  ;;  %v2152_v29 = vunpack.c.l.b16 %v2122_v19  ;;  %v2130_v35 = vpack.c.bf16 %v2126_v16, %v2126_v16  ;;  %v2131_v27 = vpack.c.bf16 %v2129_v63, %v2129_v63  ;;  %v3888_v17 = vld [vmem:[#allocation12] sm:$0xff]  ;;  %v4001_v19 = vld [vmem:[%s4684_s5 + $0x3] ss:$0 sm:$0xff] }
 0x418   : > { %v2142_v31 = vpack.c.b16 %v2141_v14, %v2140_v24  ;;  %v2153_v32 = vunpack.c.l.b16 %v2123_v28  ;;  %2638 = vmatpush.bf16.msrb.mxu3 %v3880_v44  ;;  %2722 = vmatpush.bf16.msra.mxu0 %v3891_v13  ;;  %v3890_v14 = vld [vmem:[#allocation12 + $0x10] sm:$0xff] }
 0x419   : > { %2496 = vmatmul.bf16.vlgmr.msra.gmra.mxu2 %v2136_v23  ;;  %v2158_v36 = vunpack.c.l.b16 %v2130_v35  ;;  %v2159_v37 = vunpack.c.l.b16 %v2131_v27 }
 0x41a   : > { %2510 = vmatmul.bf16.vlgmr.msra.gmra.mxu3 %v2142_v31  ;;  %v2154_v26 = vpack.c.b16 %v2153_v32, %v2152_v29 }
 0x41b   : > { %v2160_v38 = vpack.c.b16 %v2159_v37, %v2158_v36 }
 0x41c   : > { %2538 = vmatmul.bf16.vlgmr.msrb.gmra.mxu1 %v2154_v26  ;;  %2723 = vmatpush.bf16.msra.mxu0 %v3890_v14  ;;  %v2735_v26 = vand.u32 127, %v376_v0 }
 0x41e   : > { %vm2736_vm10 = vcmp.lt.s32.totalorder %v2735_v26, 32 }
 0x420   : > { %2724 = vmatpush.bf16.msra.mxu0 %v3889_v15 }
 0x424   : > { %2725 = vmatpush.bf16.msra.mxu0 %v3888_v17 }
 0x429   : > { %2552 = vmatmul.bf16.vlgmr.msrb.gmra.mxu2 %v2160_v38 }
 0x492   : > { %v2525_v22 = vpop.f32.mrf.mxu0 }
 0x499   : > { %v2539_v56 = vpop.f32.mrf.mxu1 }
 0x49a   : > { %v2527_v34 = vpop.f32.mrf.mxu0 }
 0x49c   : > { %v2497_v46 = vpop.f32.mrf.mxu2 }
 0x49d   : > { %v2511_v48 = vpop.f32.mrf.mxu3  ;;  %v2498_v53 = vadd.f32 %v4000_v49, %v2497_v46 }
 0x49f   : > { %v2512_v57 = vadd.f32 %v2511_v48, %v2498_v53 }
 0x4a1   : > { %v2526_v62 = vadd.f32 %v2525_v22, %v2512_v57  ;;  %v2541_v4 = vpop.f32.mrf.mxu1 }
 0x4a3   : > { %v2540_v2 = vadd.f32 %v2539_v56, %v2526_v62 }
 0x4a4   : > { %v2499_v52 = vpop.f32.mrf.mxu2 }
 0x4a5   : > { %v2500_v55 = vadd.f32 %v4000_v49, %v2499_v52  ;;  %v2513_v58 = vpop.f32.mrf.mxu3 }
 0x4a7   : > { %v2514_v59 = vadd.f32 %v2513_v58, %v2500_v55 }
 0x4a9   : > { %v2528_v1 = vadd.f32 %v2527_v34, %v2514_v59 }
 0x4ab   : > { %v2542_v7 = vadd.f32 %v2541_v4, %v2528_v1 }
 0x4ac   : > { %v2553_v61 = vpop.f32.mrf.mxu2 }
 0x4ad   : > { %v2554_v5 = vadd.f32 %v2553_v61, %v2540_v2 }
 0x4af   : > { %v2558_v11 = vmax.f32 %v2554_v5, 0.0 }
 0x4b4   : > { %v2555_v8 = vpop.f32.mrf.mxu2 }
 0x4b5   : > { %v2556_v9 = vadd.f32 %v2555_v8, %v2542_v7 }
 0x4b7   : > { %v2559_v12 = vmax.f32 %v2556_v9, 0.0 }
 0x4b9   : > { %v2560_v10 = vpack.c.bf16 %v2559_v12, %v2558_v11 }
 0x4bb   : > { %2639 = vmatmul.bf16.vlgmr.msrb.gmra.mxu3 %v2560_v10 }
 0x53e   : > { %v2640_v18 = vpop.f32.mrf.mxu3 }
 0x53f   : > { %v2641_v20 = vadd.f32 %v4001_v19, %v2640_v18 }
 0x541   : > { %v2645_v28 = vadd.f32 %v2641_v20, %v4599_v21 }
 0x543   : > { %v2647_v30 = vmul.f32 %v4518_v60, %v2645_v28 }
 0x546   : > { %v2642_v24 = vpop.f32.mrf.mxu3 }
 0x547   : > { %v2643_v23 = vadd.f32 %v4001_v19, %v2642_v24 }
 0x549   : > { %v2646_v29 = vadd.f32 %v2643_v23, %v4604_v50 }
 0x54b   : > { %v2648_v31 = vmul.f32 %v4526_v6, %v2646_v29 }
 0x54d   : > { %v2649_v32 = vpack.c.bf16 %v2648_v31, %v2647_v30 }
 0x54f   : > { %2726 = vmatmul.bf16.vlgmr.msra.gmra.mxu0 %v2649_v32 }
 0x5cc   : > { %v2727_v16 = vpop.f32.mrf.mxu0 }
 0x5cd   : > { %v2728_v63 = vadd.f32 %v4002_v33, %v2727_v16 }
 0x5cf   : > { %v2732_v21 = vmul.f32 %v4518_v60, %v2728_v63 }
 0x5d1   : > { %v2737_v50 = vsel %vm2736_vm10, %v2647_v30, %v2732_v21 }
 0x5d2   : > { %2739 = vst [vmem:[%s373_s22] sm:$0xff] %v2737_v50 }
 0x5d4   : > { %v2729_v35 = vpop.f32.mrf.mxu0 }
 0x5d5   : > { %v2730_v27 = vadd.f32 %v4002_v33, %v2729_v35 }
 0x5d7   : > { %v2733_v0 = vmul.f32 %v4526_v6, %v2730_v27 }
 0x5d9   : > { %v2738_v36 = vsel %vm2736_vm10, %v2648_v31, %v2733_v0 }
 0x5da   : > { %2740 = vst [vmem:[%s373_s22 + $0x8] sm:$0xff] %v2738_v36 }
 0x5db   : > { %4192 = shalt.err (!%p4189_p10)
}
 0x5dc   : > { %s4255_s26 = smov 128   ;;  %s4256_s2 = smov 8  }
 0x5dd   : > { %3915 = dma.vmem_to_hbm [thread:$0]  (%p4389_p3), %s2755_s25, 256, %s2757_s29, %s2742_s0, %s4255_s26, %s4255_s26, %s4256_s2  }
 0x5de PF: > { %s2771_s22 = sand.u32 1, %s4229_s9   ;;  %p4696_p12 = scmp.ge.s32.totalorder %s4241_s12, 2 }
 0x5df   : > { %s2772_s14 = scalar_lea.sflag [#allocation6], %s2771_s22 }
 0x5e0   : > { %p3935_p13 = pnand %p4696_p12, %p4340_p6 }
 0x5e2   : > { %p3936_p0 = pneg %p3935_p13 }
 0x5e4   : > { %4224 = dma.done.wait (%p3936_p0), %s2772_s14, 256  }
 0x5e5   : > { %4226 = vsyncadd (%p3936_p0), %s2772_s14, 4294967040  ;;  %p31_p5 = scmp.ge.s32.totalorder %s4379_s30, 4   ;;  %s4697_s9 = smov %s4233_s10 }
 0x5e6   : > { %s4698_s10 = smov %s4237_s11  ;;  %s4699_s11 = smov %s4395_s16 }
 0x5e7   : > { %s4700_s12 = smov %s4379_s30  ;;  %33 = sbr.rel (!%p31_p5) target bundleno = 13 (0xd), region = 121 }
 0x5ec   :  { %2778 = vsyncpa [#allocation5], 1 }
 0x5ed   :  { %2780 = vsyncpa [#allocation5 + $0x1], 1 }
 0x5ee   :  { %2781 = vsyncpa [#allocation8], 1 }
 0x5ef   :  { %2782 = vsyncpa [#allocation11], 1 }
 0x5f0   :  { %2783 = vsyncpa [#allocation6], 1 }
 0x5f1   :  { %2785 = vsyncpa [#allocation6 + $0x1], 1 }

</bundles_post_ra>
